<compile_context>
chip_gen: v7x
topology: tpu7x:2x2x1
jax: 0.10.0
libtpu: 0.0.40
codegen_flags: <defaults>
</compile_context>

<pallas_src>
import jax
import jax.numpy as jnp
from jax.experimental import pallas as pl
from jax.experimental.pallas import tpu as pltpu

EPS = 1e-5
NEG_SLOPE = 0.01  # default negative_slope of nn.LeakyReLU / F.leaky_relu

_TAPS = [(-1, -1), (-1, 0), (-1, 1),
         (0, -1), (0, 0), (0, 1),
         (1, -1), (1, 0), (1, 1)]


# --------------------------------------------------------------------------- #
# Kernel
# --------------------------------------------------------------------------- #
def _make_kernel(W):
    inv_w = 1.0 / W

    def kernel(x_ref,        # (NH, W*Cin)   packed input
               w_tr_ref,     # (W*Cin, L)    kron(I_W, W_tr)      transition 1x1
               bands2_ref,   # (3, L, L)     W-tap band matrices, dh = -1, 0, +1
               shifts_ref,   # (2, NH, NH)   batch-blocked H shifts, dh = -1, +1
               band1_ref,    # (L, L)        F1 depthwise, dh=0 taps (H=1 input)
               w_pwd_ref,    # (L, L)        kron(I_W, W_pwd)     pointwise 1x1
               w_pw2_ref,    # (L, L)        kron(I_W, W_pw2)     final 1x1
               mchan_ref,    # (L, L)        kron(J_W, I_C)       fold/broadcast over W
               pools_ref,    # (3, NH, NH)   row pools: [all, sub-band, per-batch]
               gb_ssn_ref,   # (2, NH, L)    SSN gamma/beta pre-broadcast to rows
               vecs_ref,     # (9, L)        per-channel vectors tiled over W
               out_ref):     # (NH, L)
        f32 = jnp.float32

        def dot(a, b):
            return jnp.dot(a, b, preferred_element_type=f32)

        def leaky(t):
            return jnp.where(t >= 0, t, NEG_SLOPE * t)

        mchan = mchan_ref[...]
        vecs = vecs_ref[...]
        b_tr, g_bn1, be_bn1 = vecs[0:1], vecs[1:2], vecs[2:3]
        b_dw2, b_dw1, b_pwd = vecs[3:4], vecs[4:5], vecs[5:6]
        g_bn3, be_bn3, b_pw2 = vecs[6:7], vecs[7:8], vecs[8:9]

        def pooled_norm(t, pool, gamma, beta):
            # Training-mode batch-norm with per-(pool-group, channel) statistics.
            # `pool` averages over the rows of a group; `mchan` folds + re-broadcasts
            # over the W positions packed in the lane axis.  One-pass variance.
            pm = dot(dot(pool, t), mchan) * inv_w
            pm2 = dot(dot(pool, t * t), mchan) * inv_w
            scale = gamma * jax.lax.rsqrt(pm2 - pm * pm + EPS)
            return t * scale + (beta - pm * scale)

        mball = pools_ref[0]   # all rows             -> BatchNorm2d stats
        msub = pools_ref[1]    # same frequency band  -> SubSpectralNorm stats
        mhavg = pools_ref[2]   # same batch sample    -> mean over frequency (H)

        # ---------------- F2: 1x1 transition conv -> BN -> LeakyReLU -----------
        y = dot(x_ref[...], w_tr_ref[...]) + b_tr
        y = leaky(pooled_norm(y, mball, g_bn1, be_bn1))

        # ---------------- F2: 3x3 depthwise conv (banded + shift matmuls) ------
        z = dot(y, bands2_ref[1])                              # dh = 0
        z = z + dot(shifts_ref[0], dot(y, bands2_ref[0]))      # dh = -1
        z = z + dot(shifts_ref[1], dot(y, bands2_ref[2]))      # dh = +1
        z = z + b_dw2

        # ---------------- F2: SubSpectralNorm -----------------------------------
        x2 = pooled_norm(z, msub, gb_ssn_ref[0], gb_ssn_ref[1])

        # ---------------- broadcast path: mean over frequency (H) ---------------
        # Kept at full row breadth (rows duplicated per batch): duplicated rows
        # leave the following BatchNorm statistics identical, and the residual
        # broadcast-add becomes a plain elementwise add.
        xp = dot(mhavg, x2)

        # ---------------- F1: depth-separable conv -> BN -> SiLU -> 1x1 ---------
        # Depthwise 3x3 on an H=1 zero-padded input: only the dh=0 taps survive.
        a = dot(xp, band1_ref[...]) + b_dw1
        a = dot(a, w_pwd_ref[...]) + b_pwd
        a = pooled_norm(a, mball, g_bn3, be_bn3)
        a = a * pl.reciprocal(1.0 + jnp.exp(-a), approx=True)   # SiLU (EUP recip)
        a = dot(a, w_pw2_ref[...]) + b_pw2

        # ---------------- residual add + LeakyReLU (lane-dense full-width store)
        out_ref[...] = leaky(x2 + a)

    return kernel


# --------------------------------------------------------------------------- #
# Wrapper: layout packing + pallas_call
# --------------------------------------------------------------------------- #
def _pack_inputs(x_nchw, p, S):
    f32 = jnp.float32
    N, Cin, H, W = x_nchw.shape
    Cout = p["w_tr"].shape[1]
    assert H % S == 0, "frequency dim must be divisible by the number of sub-bands"
    NH, L, Lin = N * H, W * Cout, W * Cin
    Hs = H // S

    # Single layout transform to the lane-dense packed form:
    # rows = N*H, lanes = W*Cin (and W*Cout = 128 on the output side).
    x_p = jnp.transpose(x_nchw.astype(f32), (0, 2, 3, 1)).reshape(NH, Lin)

    lane = jnp.arange(L)
    w_of = lane // Cout
    c_of = lane % Cout

    def tile_c(v):                       # (C,)/(1,C) -> (L,): lane w*C+c -> v[c]
        return v.reshape(-1).astype(f32)[c_of]

    def band(taps3):                     # taps3: (3, C) for dw = -1, 0, +1 -> (L, L)
        same_c = c_of[:, None] == c_of[None, :]
        dw_lane = w_of[:, None] - w_of[None, :]
        B = jnp.zeros((L, L), f32)
        for j, dw in enumerate((-1, 0, 1)):
            B = B + jnp.where(same_c & (dw_lane == dw),
                              taps3[j].astype(f32)[c_of][None, :], 0.0)
        return B

    r = jnp.arange(NH)
    n_of = r // H
    s_of = (r % H) // Hs

    def shift_mat(dh):                   # out[r] = in[r + dh] within the same batch
        return ((r[None, :] == r[:, None] + dh) &
                (n_of[None, :] == n_of[:, None])).astype(f32)

    mball = jnp.full((NH, NH), 1.0 / NH, f32)                       # BatchNorm pool
    msub = (s_of[:, None] == s_of[None, :]).astype(f32) / (N * Hs)  # SubSpectral pool
    mhavg = (n_of[:, None] == n_of[None, :]).astype(f32) / H        # per-batch H-mean

    mchan = jnp.kron(jnp.ones((W, W), f32), jnp.eye(Cout, dtype=f32))

    vecs = jnp.stack([tile_c(p["b_tr"]), tile_c(p["g_bn1"]), tile_c(p["be_bn1"]),
                      tile_c(p["b_dw2"]), tile_c(p["b_dw1"]), tile_c(p["b_pwd"]),
                      tile_c(p["g_bn3"]), tile_c(p["be_bn3"]), tile_c(p["b_pw2"])])

    gb_ssn = jnp.stack([p["g_ssn"].astype(f32)[s_of][:, c_of],
                        p["be_ssn"].astype(f32)[s_of][:, c_of]])    # (2, NH, L)

    args = (
        x_p,
        jnp.kron(jnp.eye(W, dtype=f32), p["w_tr"].astype(f32)),     # (Lin, L)
        jnp.stack([band(p["w_dw2"][0:3]),                           # dh = -1
                   band(p["w_dw2"][3:6]),                           # dh =  0
                   band(p["w_dw2"][6:9])]),                         # dh = +1
        jnp.stack([shift_mat(-1), shift_mat(1)]),
        band(p["w_dw1"][3:6]),                                      # dh = 0 row only
        jnp.kron(jnp.eye(W, dtype=f32), p["w_pwd"].astype(f32)),
        jnp.kron(jnp.eye(W, dtype=f32), p["w_pw2"].astype(f32)),
        mchan,
        jnp.stack([mball, msub, mhavg]),
        gb_ssn,
        vecs,
    )
    return args, (N, H, W, Cout, NH, L)


def bc_resblock(x_nchw, params, S=5):
    """x_nchw: (N, Cin, H, W) float32 -> (N, Cout, H, W) float32."""
    args, (N, H, W, Cout, NH, L) = _pack_inputs(x_nchw, params, S)
    kernel = _make_kernel(W)

    vmem = pl.BlockSpec(memory_space=pltpu.MemorySpace.VMEM)
    out_p = pl.pallas_call(
        kernel,
        out_shape=jax.ShapeDtypeStruct((NH, L), jnp.float32),
        in_specs=[vmem] * len(args),
        out_specs=vmem,
        compiler_params=pltpu.CompilerParams(vmem_limit_bytes=32 * 1024 * 1024),
    )(*args)

    # Single cheap layout transform back to the module's NCHW interface.
    return jnp.transpose(out_p.reshape(N, H, W, Cout), (0, 3, 1, 2))


# --------------------------------------------------------------------------- #
# Parameters (same "module" parameterization as before)
# --------------------------------------------------------------------------- #
def init_params(key, Cin, Cout, S):
    ks = jax.random.split(key, 16)

    def nrm(k, shape, scale=0.1):
        return scale * jax.random.normal(k, shape, jnp.float32)

    return {
        # F2
        "w_tr": nrm(ks[0], (Cin, Cout)),       # 1x1 conv weight (Cin, Cout)
        "b_tr": nrm(ks[1], (1, Cout)),
        "g_bn1": 1.0 + nrm(ks[2], (1, Cout)),
        "be_bn1": nrm(ks[3], (1, Cout)),
        "w_dw2": nrm(ks[4], (9, Cout)),        # depthwise taps, row (dh+1)*3+(dw+1)
        "b_dw2": nrm(ks[5], (1, Cout)),
        "g_ssn": 1.0 + nrm(ks[6], (S, Cout)),  # per (sub-band, channel) affine
        "be_ssn": nrm(ks[7], (S, Cout)),
        # F1
        "w_dw1": nrm(ks[8], (9, Cout)),
        "b_dw1": nrm(ks[9], (1, Cout)),
        "w_pwd": nrm(ks[10], (Cout, Cout)),
        "b_pwd": nrm(ks[11], (1, Cout)),
        "g_bn3": 1.0 + nrm(ks[12], (1, Cout)),
        "be_bn3": nrm(ks[13], (1, Cout)),
        "w_pw2": nrm(ks[14], (Cout, Cout)),
        "b_pw2": nrm(ks[15], (1, Cout)),
    }


# --------------------------------------------------------------------------- #
# Pure-JAX reference (for a correctness check at loose tolerance)
# --------------------------------------------------------------------------- #
def reference_forward(x_nchw, p, S):
    f32 = jnp.float32
    x = jnp.transpose(x_nchw.astype(f32), (0, 2, 3, 1))      # NHWC
    N, H, W, Cin = x.shape
    Cout = p["w_tr"].shape[1]
    hp = "highest"

    def leaky(t):
        return jnp.where(t >= 0, t, NEG_SLOPE * t)

    # F2: 1x1 conv -> BN (training stats) -> LeakyReLU
    y = jnp.einsum("nhwi,io->nhwo", x, p["w_tr"], precision=hp) + p["b_tr"].reshape(-1)
    m = y.mean(axis=(0, 1, 2))
    v = ((y - m) ** 2).mean(axis=(0, 1, 2))
    y = (y - m) * jax.lax.rsqrt(v + EPS) * p["g_bn1"].reshape(-1) + p["be_bn1"].reshape(-1)
    y = leaky(y)

    # F2: 3x3 depthwise conv
    ypad = jnp.pad(y, ((0, 0), (1, 1), (1, 1), (0, 0)))
    z = jnp.zeros_like(y)
    for t, (dh, dw) in enumerate(_TAPS):
        z = z + ypad[:, 1 + dh:1 + dh + H, 1 + dw:1 + dw + W, :] * p["w_dw2"][t]
    z = z + p["b_dw2"].reshape(-1)

    # F2: SubSpectralNorm
    Hs = H // S
    zz = z.reshape(N, S, Hs, W, Cout)
    ms = zz.mean(axis=(0, 2, 3), keepdims=True)
    vs = ((zz - ms) ** 2).mean(axis=(0, 2, 3), keepdims=True)
    g = p["g_ssn"].reshape(1, S, 1, 1, Cout)
    b = p["be_ssn"].reshape(1, S, 1, 1, Cout)
    x2 = ((zz - ms) * jax.lax.rsqrt(vs + EPS) * g + b).reshape(N, H, W, Cout)

    # broadcast path
    xp = x2.mean(axis=1, keepdims=True)

    # F1: depthwise 3x3 (H=1) + pointwise 1x1
    xpad = jnp.pad(xp, ((0, 0), (1, 1), (1, 1), (0, 0)))
    a = jnp.zeros_like(xp)
    for t, (dh, dw) in enumerate(_TAPS):
        a = a + xpad[:, 1 + dh:2 + dh, 1 + dw:1 + dw + W, :] * p["w_dw1"][t]
    a = a + p["b_dw1"].reshape(-1)
    a = jnp.einsum("nhwi,io->nhwo", a, p["w_pwd"], precision=hp) + p["b_pwd"].reshape(-1)

    # F1: BN -> SiLU -> 1x1 conv
    m3 = a.mean(axis=(0, 1, 2))
    v3 = ((a - m3) ** 2).mean(axis=(0, 1, 2))
    a = (a - m3) * jax.lax.rsqrt(v3 + EPS) * p["g_bn3"].reshape(-1) + p["be_bn3"].reshape(-1)
    a = a * jax.nn.sigmoid(a)
    a = jnp.einsum("nhwi,io->nhwo", a, p["w_pw2"], precision=hp) + p["b_pw2"].reshape(-1)

    out = leaky(x2 + a)
    return jnp.transpose(out, (0, 3, 1, 2))


# --------------------------------------------------------------------------- #
if __name__ == "__main__":
    key = jax.random.PRNGKey(0)
    kx, kp = jax.random.split(key)

    N, Cin, Cout, S = 2, 4, 8, 5
    H, W = 20, 16                      # H divisible by S; W * Cout = 128 lanes

    x = jax.random.normal(kx, (N, Cin, H, W), dtype=jnp.float32)
    params = init_params(kp, Cin, Cout, S)

    out = jax.jit(bc_resblock, static_argnames=("S",))(x, params, S=S)
    out = jax.block_until_ready(out)

    assert out.shape == (N, Cout, H, W), out.shape
    assert bool(jnp.all(jnp.isfinite(out)))

    ref = reference_forward(x, params, S)
    err = float(jnp.max(jnp.abs(out - ref)))
    scale = float(jnp.max(jnp.abs(ref))) + 1e-6
    assert err / scale < 5e-2, (err, scale)

    print("KERNEL_OK")
</pallas_src>

<mosaic_0001>
module attributes {stable_mosaic.version = 11 : i64} {
  func.func @kernel(%arg0: memref<40x64xf32, #tpu.memory_space<vmem>>, %arg1: memref<64x128xf32, #tpu.memory_space<vmem>>, %arg2: memref<3x128x128xf32, #tpu.memory_space<vmem>>, %arg3: memref<2x40x40xf32, #tpu.memory_space<vmem>>, %arg4: memref<128x128xf32, #tpu.memory_space<vmem>>, %arg5: memref<128x128xf32, #tpu.memory_space<vmem>>, %arg6: memref<128x128xf32, #tpu.memory_space<vmem>>, %arg7: memref<128x128xf32, #tpu.memory_space<vmem>>, %arg8: memref<3x40x40xf32, #tpu.memory_space<vmem>>, %arg9: memref<2x40x128xf32, #tpu.memory_space<vmem>>, %arg10: memref<9x128xf32, #tpu.memory_space<vmem>>, %arg11: memref<40x128xf32, #tpu.memory_space<vmem>>) attributes {dimension_semantics = [], scalar_prefetch = 0 : i64, scratch_operands = 0 : i64, tpu.core_type = #tpu.core_type<tc>} {
    %c0 = arith.constant 0 : index
    %c0_0 = arith.constant 0 : index
    %0 = vector.load %arg7[%c0, %c0_0] : memref<128x128xf32, #tpu.memory_space<vmem>>, vector<128x128xf32>
    %c0_1 = arith.constant 0 : index
    %c0_2 = arith.constant 0 : index
    %1 = vector.load %arg10[%c0_1, %c0_2] : memref<9x128xf32, #tpu.memory_space<vmem>>, vector<9x128xf32>
    %2 = vector.extract_strided_slice %1 {offsets = [0, 0], sizes = [1, 128], strides = [1, 1]} : vector<9x128xf32> to vector<1x128xf32>
    %3 = vector.extract_strided_slice %1 {offsets = [1, 0], sizes = [1, 128], strides = [1, 1]} : vector<9x128xf32> to vector<1x128xf32>
    %4 = vector.extract_strided_slice %1 {offsets = [2, 0], sizes = [1, 128], strides = [1, 1]} : vector<9x128xf32> to vector<1x128xf32>
    %5 = vector.extract_strided_slice %1 {offsets = [3, 0], sizes = [1, 128], strides = [1, 1]} : vector<9x128xf32> to vector<1x128xf32>
    %6 = vector.extract_strided_slice %1 {offsets = [4, 0], sizes = [1, 128], strides = [1, 1]} : vector<9x128xf32> to vector<1x128xf32>
    %7 = vector.extract_strided_slice %1 {offsets = [5, 0], sizes = [1, 128], strides = [1, 1]} : vector<9x128xf32> to vector<1x128xf32>
    %8 = vector.extract_strided_slice %1 {offsets = [6, 0], sizes = [1, 128], strides = [1, 1]} : vector<9x128xf32> to vector<1x128xf32>
    %9 = vector.extract_strided_slice %1 {offsets = [7, 0], sizes = [1, 128], strides = [1, 1]} : vector<9x128xf32> to vector<1x128xf32>
    %10 = vector.extract_strided_slice %1 {offsets = [8, 0], sizes = [1, 128], strides = [1, 1]} : vector<9x128xf32> to vector<1x128xf32>
    %c0_3 = arith.constant 0 : index
    %c0_4 = arith.constant 0 : index
    %c0_5 = arith.constant 0 : index
    %11 = vector.load %arg8[%c0_3, %c0_4, %c0_5] : memref<3x40x40xf32, #tpu.memory_space<vmem>>, vector<1x40x40xf32>
    %12 = vector.shape_cast %11 : vector<1x40x40xf32> to vector<40x40xf32>
    %c1 = arith.constant 1 : index
    %c0_6 = arith.constant 0 : index
    %c0_7 = arith.constant 0 : index
    %13 = vector.load %arg8[%c1, %c0_6, %c0_7] : memref<3x40x40xf32, #tpu.memory_space<vmem>>, vector<1x40x40xf32>
    %14 = vector.shape_cast %13 : vector<1x40x40xf32> to vector<40x40xf32>
    %c2 = arith.constant 2 : index
    %c0_8 = arith.constant 0 : index
    %c0_9 = arith.constant 0 : index
    %15 = vector.load %arg8[%c2, %c0_8, %c0_9] : memref<3x40x40xf32, #tpu.memory_space<vmem>>, vector<1x40x40xf32>
    %16 = vector.shape_cast %15 : vector<1x40x40xf32> to vector<40x40xf32>
    %c0_10 = arith.constant 0 : index
    %c0_11 = arith.constant 0 : index
    %17 = vector.load %arg0[%c0_10, %c0_11] : memref<40x64xf32, #tpu.memory_space<vmem>>, vector<40x64xf32>
    %c0_12 = arith.constant 0 : index
    %c0_13 = arith.constant 0 : index
    %18 = vector.load %arg1[%c0_12, %c0_13] : memref<64x128xf32, #tpu.memory_space<vmem>>, vector<64x128xf32>
    %cst = arith.constant dense<0.000000e+00> : vector<40x128xf32>
    %19 = tpu.matmul %17, %18, %cst {dimension_numbers = #tpu.dot_dimension_numbers<[1], [0], [0], [1], [0, 0, 1, 1], [], []>} : vector<40x64xf32>, vector<64x128xf32>, vector<40x128xf32> -> vector<40x128xf32>
    %20 = vector.broadcast %2 : vector<1x128xf32> to vector<40x128xf32>
    %21 = arith.addf %19, %20 : vector<40x128xf32>
    %cst_14 = arith.constant dense<0.000000e+00> : vector<40x128xf32>
    %22 = tpu.matmul %12, %21, %cst_14 {dimension_numbers = #tpu.dot_dimension_numbers<[1], [0], [0], [1], [0, 0, 1, 1], [], []>} : vector<40x40xf32>, vector<40x128xf32>, vector<40x128xf32> -> vector<40x128xf32>
    %cst_15 = arith.constant dense<0.000000e+00> : vector<40x128xf32>
    %23 = tpu.matmul %22, %0, %cst_15 {dimension_numbers = #tpu.dot_dimension_numbers<[1], [0], [0], [1], [0, 0, 1, 1], [], []>} : vector<40x128xf32>, vector<128x128xf32>, vector<40x128xf32> -> vector<40x128xf32>
    %cst_16 = arith.constant 6.250000e-02 : f32
    %24 = vector.broadcast %cst_16 : f32 to vector<40x128xf32>
    %25 = arith.mulf %23, %24 : vector<40x128xf32>
    %26 = arith.mulf %21, %21 : vector<40x128xf32>
    %cst_17 = arith.constant dense<0.000000e+00> : vector<40x128xf32>
    %27 = tpu.matmul %12, %26, %cst_17 {dimension_numbers = #tpu.dot_dimension_numbers<[1], [0], [0], [1], [0, 0, 1, 1], [], []>} : vector<40x40xf32>, vector<40x128xf32>, vector<40x128xf32> -> vector<40x128xf32>
    %cst_18 = arith.constant dense<0.000000e+00> : vector<40x128xf32>
    %28 = tpu.matmul %27, %0, %cst_18 {dimension_numbers = #tpu.dot_dimension_numbers<[1], [0], [0], [1], [0, 0, 1, 1], [], []>} : vector<40x128xf32>, vector<128x128xf32>, vector<40x128xf32> -> vector<40x128xf32>
    %cst_19 = arith.constant 6.250000e-02 : f32
    %29 = vector.broadcast %cst_19 : f32 to vector<40x128xf32>
    %30 = arith.mulf %28, %29 : vector<40x128xf32>
    %31 = arith.mulf %25, %25 : vector<40x128xf32>
    %32 = arith.subf %30, %31 : vector<40x128xf32>
    %cst_20 = arith.constant 9.99999974E-6 : f32
    %33 = vector.broadcast %cst_20 : f32 to vector<40x128xf32>
    %34 = arith.addf %32, %33 : vector<40x128xf32>
    %35 = math.rsqrt %34 : vector<40x128xf32>
    %36 = vector.broadcast %3 : vector<1x128xf32> to vector<40x128xf32>
    %37 = arith.mulf %36, %35 : vector<40x128xf32>
    %38 = arith.mulf %21, %37 : vector<40x128xf32>
    %39 = arith.mulf %25, %37 : vector<40x128xf32>
    %40 = vector.broadcast %4 : vector<1x128xf32> to vector<40x128xf32>
    %41 = arith.subf %40, %39 : vector<40x128xf32>
    %42 = arith.addf %38, %41 : vector<40x128xf32>
    %cst_21 = arith.constant 0.000000e+00 : f32
    %43 = vector.broadcast %cst_21 : f32 to vector<40x128xf32>
    %44 = arith.cmpf oge, %42, %43 : vector<40x128xf32>
    %cst_22 = arith.constant 0.00999999977 : f32
    %45 = vector.broadcast %cst_22 : f32 to vector<40x128xf32>
    %46 = arith.mulf %45, %42 : vector<40x128xf32>
    %47 = arith.select %44, %42, %46 : vector<40x128xi1>, vector<40x128xf32>
    %c1_23 = arith.constant 1 : index
    %c0_24 = arith.constant 0 : index
    %c0_25 = arith.constant 0 : index
    %48 = vector.load %arg2[%c1_23, %c0_24, %c0_25] : memref<3x128x128xf32, #tpu.memory_space<vmem>>, vector<1x128x128xf32>
    %49 = vector.shape_cast %48 : vector<1x128x128xf32> to vector<128x128xf32>
    %cst_26 = arith.constant dense<0.000000e+00> : vector<40x128xf32>
    %50 = tpu.matmul %47, %49, %cst_26 {dimension_numbers = #tpu.dot_dimension_numbers<[1], [0], [0], [1], [0, 0, 1, 1], [], []>} : vector<40x128xf32>, vector<128x128xf32>, vector<40x128xf32> -> vector<40x128xf32>
    %c0_27 = arith.constant 0 : index
    %c0_28 = arith.constant 0 : index
    %c0_29 = arith.constant 0 : index
    %51 = vector.load %arg3[%c0_27, %c0_28, %c0_29] : memref<2x40x40xf32, #tpu.memory_space<vmem>>, vector<1x40x40xf32>
    %52 = vector.shape_cast %51 : vector<1x40x40xf32> to vector<40x40xf32>
    %c0_30 = arith.constant 0 : index
    %c0_31 = arith.constant 0 : index
    %c0_32 = arith.constant 0 : index
    %53 = vector.load %arg2[%c0_30, %c0_31, %c0_32] : memref<3x128x128xf32, #tpu.memory_space<vmem>>, vector<1x128x128xf32>
    %54 = vector.shape_cast %53 : vector<1x128x128xf32> to vector<128x128xf32>
    %cst_33 = arith.constant dense<0.000000e+00> : vector<40x128xf32>
    %55 = tpu.matmul %47, %54, %cst_33 {dimension_numbers = #tpu.dot_dimension_numbers<[1], [0], [0], [1], [0, 0, 1, 1], [], []>} : vector<40x128xf32>, vector<128x128xf32>, vector<40x128xf32> -> vector<40x128xf32>
    %cst_34 = arith.constant dense<0.000000e+00> : vector<40x128xf32>
    %56 = tpu.matmul %52, %55, %cst_34 {dimension_numbers = #tpu.dot_dimension_numbers<[1], [0], [0], [1], [0, 0, 1, 1], [], []>} : vector<40x40xf32>, vector<40x128xf32>, vector<40x128xf32> -> vector<40x128xf32>
    %57 = arith.addf %50, %56 : vector<40x128xf32>
    %c1_35 = arith.constant 1 : index
    %c0_36 = arith.constant 0 : index
    %c0_37 = arith.constant 0 : index
    %58 = vector.load %arg3[%c1_35, %c0_36, %c0_37] : memref<2x40x40xf32, #tpu.memory_space<vmem>>, vector<1x40x40xf32>
    %59 = vector.shape_cast %58 : vector<1x40x40xf32> to vector<40x40xf32>
    %c2_38 = arith.constant 2 : index
    %c0_39 = arith.constant 0 : index
    %c0_40 = arith.constant 0 : index
    %60 = vector.load %arg2[%c2_38, %c0_39, %c0_40] : memref<3x128x128xf32, #tpu.memory_space<vmem>>, vector<1x128x128xf32>
    %61 = vector.shape_cast %60 : vector<1x128x128xf32> to vector<128x128xf32>
    %cst_41 = arith.constant dense<0.000000e+00> : vector<40x128xf32>
    %62 = tpu.matmul %47, %61, %cst_41 {dimension_numbers = #tpu.dot_dimension_numbers<[1], [0], [0], [1], [0, 0, 1, 1], [], []>} : vector<40x128xf32>, vector<128x128xf32>, vector<40x128xf32> -> vector<40x128xf32>
    %cst_42 = arith.constant dense<0.000000e+00> : vector<40x128xf32>
    %63 = tpu.matmul %59, %62, %cst_42 {dimension_numbers = #tpu.dot_dimension_numbers<[1], [0], [0], [1], [0, 0, 1, 1], [], []>} : vector<40x40xf32>, vector<40x128xf32>, vector<40x128xf32> -> vector<40x128xf32>
    %64 = arith.addf %57, %63 : vector<40x128xf32>
    %65 = vector.broadcast %5 : vector<1x128xf32> to vector<40x128xf32>
    %66 = arith.addf %64, %65 : vector<40x128xf32>
    %c0_43 = arith.constant 0 : index
    %c0_44 = arith.constant 0 : index
    %c0_45 = arith.constant 0 : index
    %67 = vector.load %arg9[%c0_43, %c0_44, %c0_45] : memref<2x40x128xf32, #tpu.memory_space<vmem>>, vector<1x40x128xf32>
    %68 = vector.shape_cast %67 : vector<1x40x128xf32> to vector<40x128xf32>
    %c1_46 = arith.constant 1 : index
    %c0_47 = arith.constant 0 : index
    %c0_48 = arith.constant 0 : index
    %69 = vector.load %arg9[%c1_46, %c0_47, %c0_48] : memref<2x40x128xf32, #tpu.memory_space<vmem>>, vector<1x40x128xf32>
    %70 = vector.shape_cast %69 : vector<1x40x128xf32> to vector<40x128xf32>
    %cst_49 = arith.constant dense<0.000000e+00> : vector<40x128xf32>
    %71 = tpu.matmul %14, %66, %cst_49 {dimension_numbers = #tpu.dot_dimension_numbers<[1], [0], [0], [1], [0, 0, 1, 1], [], []>} : vector<40x40xf32>, vector<40x128xf32>, vector<40x128xf32> -> vector<40x128xf32>
    %cst_50 = arith.constant dense<0.000000e+00> : vector<40x128xf32>
    %72 = tpu.matmul %71, %0, %cst_50 {dimension_numbers = #tpu.dot_dimension_numbers<[1], [0], [0], [1], [0, 0, 1, 1], [], []>} : vector<40x128xf32>, vector<128x128xf32>, vector<40x128xf32> -> vector<40x128xf32>
    %cst_51 = arith.constant 6.250000e-02 : f32
    %73 = vector.broadcast %cst_51 : f32 to vector<40x128xf32>
    %74 = arith.mulf %72, %73 : vector<40x128xf32>
    %75 = arith.mulf %66, %66 : vector<40x128xf32>
    %cst_52 = arith.constant dense<0.000000e+00> : vector<40x128xf32>
    %76 = tpu.matmul %14, %75, %cst_52 {dimension_numbers = #tpu.dot_dimension_numbers<[1], [0], [0], [1], [0, 0, 1, 1], [], []>} : vector<40x40xf32>, vector<40x128xf32>, vector<40x128xf32> -> vector<40x128xf32>
    %cst_53 = arith.constant dense<0.000000e+00> : vector<40x128xf32>
    %77 = tpu.matmul %76, %0, %cst_53 {dimension_numbers = #tpu.dot_dimension_numbers<[1], [0], [0], [1], [0, 0, 1, 1], [], []>} : vector<40x128xf32>, vector<128x128xf32>, vector<40x128xf32> -> vector<40x128xf32>
    %cst_54 = arith.constant 6.250000e-02 : f32
    %78 = vector.broadcast %cst_54 : f32 to vector<40x128xf32>
    %79 = arith.mulf %77, %78 : vector<40x128xf32>
    %80 = arith.mulf %74, %74 : vector<40x128xf32>
    %81 = arith.subf %79, %80 : vector<40x128xf32>
    %cst_55 = arith.constant 9.99999974E-6 : f32
    %82 = vector.broadcast %cst_55 : f32 to vector<40x128xf32>
    %83 = arith.addf %81, %82 : vector<40x128xf32>
    %84 = math.rsqrt %83 : vector<40x128xf32>
    %85 = arith.mulf %68, %84 : vector<40x128xf32>
    %86 = arith.mulf %66, %85 : vector<40x128xf32>
    %87 = arith.mulf %74, %85 : vector<40x128xf32>
    %88 = arith.subf %70, %87 : vector<40x128xf32>
    %89 = arith.addf %86, %88 : vector<40x128xf32>
    %cst_56 = arith.constant dense<0.000000e+00> : vector<40x128xf32>
    %90 = tpu.matmul %16, %89, %cst_56 {dimension_numbers = #tpu.dot_dimension_numbers<[1], [0], [0], [1], [0, 0, 1, 1], [], []>} : vector<40x40xf32>, vector<40x128xf32>, vector<40x128xf32> -> vector<40x128xf32>
    %c0_57 = arith.constant 0 : index
    %c0_58 = arith.constant 0 : index
    %91 = vector.load %arg4[%c0_57, %c0_58] : memref<128x128xf32, #tpu.memory_space<vmem>>, vector<128x128xf32>
    %cst_59 = arith.constant dense<0.000000e+00> : vector<40x128xf32>
    %92 = tpu.matmul %90, %91, %cst_59 {dimension_numbers = #tpu.dot_dimension_numbers<[1], [0], [0], [1], [0, 0, 1, 1], [], []>} : vector<40x128xf32>, vector<128x128xf32>, vector<40x128xf32> -> vector<40x128xf32>
    %93 = vector.broadcast %6 : vector<1x128xf32> to vector<40x128xf32>
    %94 = arith.addf %92, %93 : vector<40x128xf32>
    %c0_60 = arith.constant 0 : index
    %c0_61 = arith.constant 0 : index
    %95 = vector.load %arg5[%c0_60, %c0_61] : memref<128x128xf32, #tpu.memory_space<vmem>>, vector<128x128xf32>
    %cst_62 = arith.constant dense<0.000000e+00> : vector<40x128xf32>
    %96 = tpu.matmul %94, %95, %cst_62 {dimension_numbers = #tpu.dot_dimension_numbers<[1], [0], [0], [1], [0, 0, 1, 1], [], []>} : vector<40x128xf32>, vector<128x128xf32>, vector<40x128xf32> -> vector<40x128xf32>
    %97 = vector.broadcast %7 : vector<1x128xf32> to vector<40x128xf32>
    %98 = arith.addf %96, %97 : vector<40x128xf32>
    %cst_63 = arith.constant dense<0.000000e+00> : vector<40x128xf32>
    %99 = tpu.matmul %12, %98, %cst_63 {dimension_numbers = #tpu.dot_dimension_numbers<[1], [0], [0], [1], [0, 0, 1, 1], [], []>} : vector<40x40xf32>, vector<40x128xf32>, vector<40x128xf32> -> vector<40x128xf32>
    %cst_64 = arith.constant dense<0.000000e+00> : vector<40x128xf32>
    %100 = tpu.matmul %99, %0, %cst_64 {dimension_numbers = #tpu.dot_dimension_numbers<[1], [0], [0], [1], [0, 0, 1, 1], [], []>} : vector<40x128xf32>, vector<128x128xf32>, vector<40x128xf32> -> vector<40x128xf32>
    %cst_65 = arith.constant 6.250000e-02 : f32
    %101 = vector.broadcast %cst_65 : f32 to vector<40x128xf32>
    %102 = arith.mulf %100, %101 : vector<40x128xf32>
    %103 = arith.mulf %98, %98 : vector<40x128xf32>
    %cst_66 = arith.constant dense<0.000000e+00> : vector<40x128xf32>
    %104 = tpu.matmul %12, %103, %cst_66 {dimension_numbers = #tpu.dot_dimension_numbers<[1], [0], [0], [1], [0, 0, 1, 1], [], []>} : vector<40x40xf32>, vector<40x128xf32>, vector<40x128xf32> -> vector<40x128xf32>
    %cst_67 = arith.constant dense<0.000000e+00> : vector<40x128xf32>
    %105 = tpu.matmul %104, %0, %cst_67 {dimension_numbers = #tpu.dot_dimension_numbers<[1], [0], [0], [1], [0, 0, 1, 1], [], []>} : vector<40x128xf32>, vector<128x128xf32>, vector<40x128xf32> -> vector<40x128xf32>
    %cst_68 = arith.constant 6.250000e-02 : f32
    %106 = vector.broadcast %cst_68 : f32 to vector<40x128xf32>
    %107 = arith.mulf %105, %106 : vector<40x128xf32>
    %108 = arith.mulf %102, %102 : vector<40x128xf32>
    %109 = arith.subf %107, %108 : vector<40x128xf32>
    %cst_69 = arith.constant 9.99999974E-6 : f32
    %110 = vector.broadcast %cst_69 : f32 to vector<40x128xf32>
    %111 = arith.addf %109, %110 : vector<40x128xf32>
    %112 = math.rsqrt %111 : vector<40x128xf32>
    %113 = vector.broadcast %8 : vector<1x128xf32> to vector<40x128xf32>
    %114 = arith.mulf %113, %112 : vector<40x128xf32>
    %115 = arith.mulf %98, %114 : vector<40x128xf32>
    %116 = arith.mulf %102, %114 : vector<40x128xf32>
    %117 = vector.broadcast %9 : vector<1x128xf32> to vector<40x128xf32>
    %118 = arith.subf %117, %116 : vector<40x128xf32>
    %119 = arith.addf %115, %118 : vector<40x128xf32>
    %cst_70 = arith.constant 0.000000e+00 : f32
    %120 = vector.broadcast %cst_70 : f32 to vector<40x128xf32>
    %121 = arith.subf %120, %119 : vector<40x128xf32>
    %122 = math.exp %121 : vector<40x128xf32>
    %cst_71 = arith.constant 1.000000e+00 : f32
    %123 = vector.broadcast %cst_71 : f32 to vector<40x128xf32>
    %124 = arith.addf %123, %122 : vector<40x128xf32>
    %125 = tpu.reciprocal %124 {approx = true} : vector<40x128xf32> -> vector<40x128xf32>
    %126 = arith.mulf %119, %125 : vector<40x128xf32>
    %c0_72 = arith.constant 0 : index
    %c0_73 = arith.constant 0 : index
    %127 = vector.load %arg6[%c0_72, %c0_73] : memref<128x128xf32, #tpu.memory_space<vmem>>, vector<128x128xf32>
    %cst_74 = arith.constant dense<0.000000e+00> : vector<40x128xf32>
    %128 = tpu.matmul %126, %127, %cst_74 {dimension_numbers = #tpu.dot_dimension_numbers<[1], [0], [0], [1], [0, 0, 1, 1], [], []>} : vector<40x128xf32>, vector<128x128xf32>, vector<40x128xf32> -> vector<40x128xf32>
    %129 = vector.broadcast %10 : vector<1x128xf32> to vector<40x128xf32>
    %130 = arith.addf %128, %129 : vector<40x128xf32>
    %131 = arith.addf %89, %130 : vector<40x128xf32>
    %cst_75 = arith.constant 0.000000e+00 : f32
    %132 = vector.broadcast %cst_75 : f32 to vector<40x128xf32>
    %133 = arith.cmpf oge, %131, %132 : vector<40x128xf32>
    %cst_76 = arith.constant 0.00999999977 : f32
    %134 = vector.broadcast %cst_76 : f32 to vector<40x128xf32>
    %135 = arith.mulf %134, %131 : vector<40x128xf32>
    %136 = arith.select %133, %131, %135 : vector<40x128xi1>, vector<40x128xf32>
    %c0_77 = arith.constant 0 : index
    %c0_78 = arith.constant 0 : index
    %137 = vector.load %arg11[%c0_77, %c0_78] : memref<40x128xf32, #tpu.memory_space<vmem>>, vector<40x128xf32>
    tpu.vector_store %arg11[%c0_77, %c0_78], %136 {strides = array<i32>} : memref<40x128xf32, #tpu.memory_space<vmem>>, vector<40x128xf32>,
    return
  }
}

</mosaic_0001>

<bundles_post_ra>
// kernel: bc_resblock.1
= control target key start
LH: loop header
LB: loop body
LE: loop exit
PB: predicated region body
PF: predicated region fallthrough
CT: control target
= control target key end

     0   :  { %v4270_v0 = vmov 0.0|0.0   ;;  %vm4271_vm0 = vmmov 0   ;;  %v4272_v4 = vmov 0.0   ;;  %vm90_vm1 = vcmask 523264   ;;  %s5500_s1 = inlined_call_operand.vmem [shape: f32[64,128], index: 1, kind: input, shape index: {}]   ;;  %s5501_s0 = inlined_call_operand.vmem [shape: f32[40,64], index: 0, kind: input, shape index: {}]   ;;  %s5502_s10 = inlined_call_operand.vmem [shape: f32[9,128], index: 10, kind: input, shape index: {}]   ;;  %s5503_s7 = inlined_call_operand.vmem [shape: f32[128,128], index: 7, kind: input, shape index: {}]   ;;  %s5504_s8 = inlined_call_operand.vmem [shape: f32[3,40,40], index: 8, kind: input, shape index: {}]   ;;  %s5505_s2 = inlined_call_operand.vmem [shape: f32[3,128,128], index: 2, kind: input, shape index: {}]   ;;  %s5506_s3 = inlined_call_operand.vmem [shape: f32[2,40,40], index: 3, kind: input, shape index: {}]   ;;  %s5507_s9 = inlined_call_operand.vmem [shape: f32[2,40,128], index: 9, kind: input, shape index: {}]   ;;  %s5508_s4 = inlined_call_operand.vmem [shape: f32[128,128], index: 4, kind: input, shape index: {}]   ;;  %s5509_s5 = inlined_call_operand.vmem [shape: f32[128,128], index: 5, kind: input, shape index: {}]   ;;  %s5510_s6 = inlined_call_operand.vmem [shape: f32[128,128], index: 6, kind: input, shape index: {}]   ;;  %s5511_s11 = inlined_call_operand.vmem [shape: f32[40,128], index: 11, kind: output, shape index: {}]  }
   0x1   :  { %3856 = vmatprep.subr.bf16.mxu0 %v4270_v0  ;;  %v78_v1 = vld [vmem:[%s5500_s1] sm:$0xff]  ;;  %v79_v2 = vld [vmem:[%s5500_s1 + $0x8] sm:$0xff]  ;;  %v80_v3 = vld [vmem:[%s5500_s1 + $0x10] sm:$0xff]  ;;  %3052 = vmatprep.mubr.msk.f32.mxu0 %vm4271_vm0, %v4272_v4  ;;  %v86_v19 = vlaneseq  ;;  %vm196_vm2 = vcmask 326656  }
   0x2   :  { %v3857_v5 = vpack.c.bf16 %v79_v2, %v78_v1  ;;  %v81_v6 = vld [vmem:[%s5500_s1 + $0x18] sm:$0xff]  ;;  %3868 = vmatprep.subr.bf16.mxu1 %v4270_v0  ;;  %3077 = vmatprep.mubr.msk.f32.mxu1 %vm4271_vm0, %v4272_v4  ;;  %v82_v8 = vld [vmem:[%s5500_s1 + $0x20] sm:$0xff]  ;;  %v83_v9 = vld [vmem:[%s5500_s1 + $0x28] sm:$0xff] }
   0x3   :  { %v3860_v7 = vpack.c.bf16 %v81_v6, %v80_v3  ;;  %v3863_v10 = vpack.c.bf16 %v83_v9, %v82_v8  ;;  %v84_v11 = vld [vmem:[%s5500_s1 + $0x30] sm:$0xff]  ;;  %v85_v12 = vld [vmem:[%s5500_s1 + $0x38] sm:$0xff]  ;;  %v73_v14 = vld [vmem:[%s5501_s0] sm:$0xff]  ;;  %v4392_v20 = vshrl.u32 %v86_v19, 7 }
   0x4   :  { %3858 = vmatpush3.bf16.msra.mxu0 %v3857_v5  ;;  %v3866_v13 = vpack.c.bf16 %v85_v12, %v84_v11  ;;  %v74_v15 = vld [vmem:[%s5501_s0 + $0x8] sm:$0xff]  ;;  %v75_v16 = vld [vmem:[%s5501_s0 + $0x10] sm:$0xff]  ;;  %v76_v17 = vld [vmem:[%s5501_s0 + $0x18] sm:$0xff] }
   0x5   :  { %3859 = vmatprep.subr.bf16.mxu0 %v4270_v0  ;;  %v77_v18 = vld [vmem:[%s5501_s0 + $0x20] sm:$0xff]  ;;  %v88_v21 = vsub.s32 0, %v4392_v20  ;;  %v39_v48 = vld [vmem:[%s5503_s7 + $0x8] sm:$0xff]  ;;  %v40_v52 = vld [vmem:[%s5503_s7 + $0x10] sm:$0xff] }
   0x6   :  { %v4398_v22 = vld [vmem:[%s5502_s10] sm:$0xff]  ;;  %v41_v53 = vld [vmem:[%s5503_s7 + $0x18] sm:$0xff]  ;;  %v57_v54 = vld [vmem:[%s5504_s8 + $0x8] sm:$0xff] }
   0x7   :  { %v89_v23 = vrot.slane %v4398_v22, %v88_v21  ;;  %v38_v47 = vld [vmem:[%s5503_s7] sm:$0xff]  ;;  %v4456_v55 = vpack.c.bf16 %v41_v53, %v40_v52  ;;  %v43_v57 = vld [vmem:[%s5503_s7 + $0x28] sm:$0xff]  ;;  %v58_v58 = vld [vmem:[%s5504_s8 + $0x10] sm:$0xff] }
   0x8   :  { %3861 = vmatpush3.bf16.msra.mxu0 %v3860_v7  ;;  %v56_v50 = vld [vmem:[%s5504_s8] sm:$0xff]  ;;  %v4438_v51 = vpack.c.bf16 %v39_v48, %v38_v47  ;;  %v44_v60 = vld [vmem:[%s5503_s7 + $0x30] sm:$0xff]  ;;  %v45_v61 = vld [vmem:[%s5503_s7 + $0x38] sm:$0xff] }
   0x9   :  { %3862 = vmatprep.subr.bf16.mxu0 %v4270_v0  ;;  %v42_v56 = vld [vmem:[%s5503_s7 + $0x20] sm:$0xff]  ;;  %v59_v62 = vld [vmem:[%s5504_s8 + $0x18] sm:$0xff]  ;;  %v4498_v63 = vpack.c.bf16 %v45_v61, %v44_v60  ;;  %v47_v2 = vld [vmem:[%s5503_s7 + $0x48] sm:$0xff] }
   0xa   :  { %v4477_v59 = vpack.c.bf16 %v43_v57, %v42_v56  ;;  %v46_v1 = vld [vmem:[%s5503_s7 + $0x40] sm:$0xff]  ;;  %v48_v6 = vld [vmem:[%s5503_s7 + $0x50] sm:$0xff]  ;;  %v49_v7 = vld [vmem:[%s5503_s7 + $0x58] sm:$0xff] }
   0xb   :  { %v60_v3 = vld [vmem:[%s5504_s8 + $0x20] sm:$0xff]  ;;  %v4519_v5 = vpack.c.bf16 %v47_v2, %v46_v1  ;;  %v4536_v8 = vpack.c.bf16 %v49_v7, %v48_v6  ;;  %v52_v12 = vld [vmem:[%s5503_s7 + $0x70] sm:$0xff]  ;;  %v684_v53 = vld [vmem:[%s5505_s2 + $0x38] sm:$0xff] }
   0xc   :  { %3864 = vmatpush3.bf16.msra.mxu0 %v3863_v10  ;;  %v50_v9 = vld [vmem:[%s5503_s7 + $0x60] sm:$0xff]  ;;  %v51_v10 = vld [vmem:[%s5503_s7 + $0x68] sm:$0xff]  ;;  %v683_v52 = vld [vmem:[%s5505_s2 + $0x30] sm:$0xff] }
   0xd   :  { %3865 = vmatprep.subr.bf16.mxu0 %v4270_v0  ;;  %v4552_v11 = vpack.c.bf16 %v51_v10, %v50_v9  ;;  %v681_v48 = vld [vmem:[%s5505_s2 + $0x20] sm:$0xff]  ;;  %v686_v57 = vld [vmem:[%s5505_s2 + $0x48] sm:$0xff]  ;;  %v687_v60 = vld [vmem:[%s5505_s2 + $0x50] sm:$0xff] }
   0xe   :  { %v685_v56 = vld [vmem:[%s5505_s2 + $0x40] sm:$0xff]  ;;  %v688_v61 = vld [vmem:[%s5505_s2 + $0x58] sm:$0xff]  ;;  %v690_v2 = vld [vmem:[%s5505_s2 + $0x68] sm:$0xff] }
   0xf   :  { %v689_v1 = vld [vmem:[%s5505_s2 + $0x60] sm:$0xff]  ;;  %v691_v6 = vld [vmem:[%s5505_s2 + $0x70] sm:$0xff]  ;;  %v692_v7 = vld [vmem:[%s5505_s2 + $0x78] sm:$0xff] }
  0x10   :  { %3867 = vmatpush3.bf16.msra.mxu0 %v3866_v13  ;;  %v53_v13 = vld [vmem:[%s5503_s7 + $0x78] sm:$0xff]  ;;  %v3950_v9 = vpack.c.bf16 %v692_v7, %v691_v6 }
  0x11   :  { %3898 = vmatprep.subr.bf16.mxu0 %v4270_v0 }
  0x13   :  { %3053 = vmatmul.mubr.msk.f32.vlgmr.msra.gmra.mrb[0].mxu0 %vm90_vm1, %v73_v14  ;;  %v4564_v14 = vpack.c.bf16 %v53_v13, %v52_v12 }
  0x14   :  { %3055 = vmatprep.mubr.msk.f32.mxu0 %vm4271_vm0, %v4272_v4 }
  0x17   :  { %3056 = vmatmul.mubr.msk.f32.gmra.mrb[2].mxu0 %vm90_vm1, %v74_v15  ;;  %v677_v15 = vld [vmem:[%s5505_s2] sm:$0xff] }
  0x18   :  { %3058 = vmatprep.mubr.msk.f32.mxu0 %vm4271_vm0, %v4272_v4 }
  0x1b   :  { %3059 = vmatmul.mubr.msk.f32.gmra.mrb[4].mxu0 %vm90_vm1, %v75_v16  ;;  %v678_v16 = vld [vmem:[%s5505_s2 + $0x8] sm:$0xff] }
  0x1c   :  { %3061 = vmatprep.mubr.msk.f32.mxu0 %vm4271_vm0, %v4272_v4 }
  0x1f   :  { %3062 = vmatmul.mubr.msk.f32.gmra.mrb[6].mxu0 %vm90_vm1, %v76_v17  ;;  %v3929_v17 = vpack.c.bf16 %v678_v16, %v677_v15 }
  0x20   :  { %3064 = vmatprep.mubr.msk.f32.mxu0 %vm4271_vm0, %v4272_v4 }
  0x23   :  { %3065 = vmatmul.mubr.msk.f32.gmra.mrb[8].mxu0 %vm90_vm1, %v77_v18 }
  0x24   :  { %3149 = vmatprep.mubr.msk.f32.mxu0 %vm4271_vm0, %v4272_v4 }
  0xe6   :  { %v172_v24 = vpop.f32.mrb[0].mxu0 }
  0xe7   :  { %v3054_v25 = vpop.f32.mrb[1].mxu0  ;;  %v4401_v26 = vadd.f32 %v172_v24, %v89_v23 }
  0xe9   :  { %v397_v30 = vmul.f32 %v4401_v26, %v4401_v26 }
  0xea   :  { %v177_v27 = vpop.f32.mrb[2].mxu0 }
  0xeb   :  { %v4403_v28 = vadd.f32 %v177_v27, %v89_v23  ;;  %v3057_v29 = vpop.f32.mrb[3].mxu0 }
  0xed   :  { %v398_v31 = vmul.f32 %v4403_v28, %v4403_v28  ;;  %v3869_v32 = vpack.c.bf16 %v4403_v28, %v4401_v26 }
  0xee   :  { %v182_v33 = vpop.f32.mrb[4].mxu0 }
  0xef   :  { %v3899_v34 = vpack.c.bf16 %v398_v31, %v397_v30  ;;  %v3060_v35 = vpop.f32.mrb[5].mxu0  ;;  %3870 = vmatpush3.bf16.msra.mxu1 %v3869_v32  ;;  %v4412_v36 = vadd.f32 %v182_v33, %v89_v23 }
  0xf0   :  { %3871 = vmatprep.subr.bf16.mxu1 %v4270_v0 }
  0xf1   :  { %3900 = vmatpush3.bf16.msra.mxu0 %v3899_v34  ;;  %v399_v40 = vmul.f32 %v4412_v36, %v4412_v36 }
  0xf2   :  { %v187_v37 = vpop.f32.mrb[6].mxu0  ;;  %3901 = vmatprep.subr.bf16.mxu0 %v4270_v0 }
  0xf3   :  { %v4415_v38 = vadd.f32 %v187_v37, %v89_v23  ;;  %v3063_v39 = vpop.f32.mrb[7].mxu0 }
  0xf5   :  { %v400_v41 = vmul.f32 %v4415_v38, %v4415_v38  ;;  %v3872_v42 = vpack.c.bf16 %v4415_v38, %v4412_v36 }
  0xf6   :  { %v192_v43 = vpop.f32.mrb[8].mxu0 }
  0xf7   :  { %v3902_v44 = vpack.c.bf16 %v400_v41, %v399_v40  ;;  %v4423_v45 = vadd.f32 %v192_v43, %v89_v23  ;;  %3873 = vmatpush3.bf16.msra.mxu1 %v3872_v42  ;;  %v3066_v46 = vpop.f32.mrb[9].mxu0 }
  0xf8   :  { %3075 = vmatprep.subr.mxu1 %v4272_v4  ;;  %v680_v46 = vld [vmem:[%s5505_s2 + $0x18] sm:$0xff] }
  0xf9   :  { %v401_v49 = vmul.f32 %v4423_v45, %v4423_v45  ;;  %3903 = vmatpush3.bf16.msra.mxu0 %v3902_v44  ;;  %v679_v44 = vld [vmem:[%s5505_s2 + $0x10] sm:$0xff] }
  0xfa   :  { %3147 = vmatprep.subr.mxu0 %v4272_v4  ;;  %v3932_v47 = vpack.c.bf16 %v680_v46, %v679_v44  ;;  %v609_v44 = vsub.s32 1, %v4392_v20 }
  0xfb   :  { %3076 = vmatpush3.msra.mxu1 %v4423_v45 }
  0xfc   :  { %3078 = vmatmul.mubr.msk.f32.vlgmr.msra.gmra.mrb[0].mxu1 %vm196_vm2, %v56_v50  ;;  %3874 = vmatprep.subr.bf16.mxu1 %v4270_v0 }
  0xfd   :  { %3148 = vmatpush3.msra.mxu0 %v401_v49  ;;  %3080 = vmatprep.mubr.msk.f32.mxu1 %vm4271_vm0, %v4272_v4  ;;  %v682_v49 = vld [vmem:[%s5505_s2 + $0x28] sm:$0xff] }
  0xfe   :  { %3150 = vmatmul.mubr.msk.f32.vlgmr.msra.gmra.mrb[10].mxu0 %vm196_vm2, %v56_v50  ;;  %3876 = vmatpush3.bf16.msra.mxu1 %v4438_v51  ;;  %v3935_v50 = vpack.c.bf16 %v682_v49, %v681_v48 }
  0xff   :  { %3152 = vmatprep.mubr.msk.f32.mxu0 %vm4271_vm0, %v4272_v4  ;;  %3904 = vmatprep.subr.bf16.mxu0 %v4270_v0 }
 0x100   :  { %3081 = vmatmul.mubr.msk.f32.gmra.mrb[2].mxu1 %vm196_vm2, %v57_v54  ;;  %3906 = vmatpush3.bf16.msra.mxu0 %v4438_v51 }
 0x101   :  { %3083 = vmatprep.mubr.msk.f32.mxu1 %vm4271_vm0, %v4272_v4  ;;  %3877 = vmatprep.subr.bf16.mxu1 %v4270_v0 }
 0x102   :  { %3153 = vmatmul.mubr.msk.f32.gmra.mrb[12].mxu0 %vm196_vm2, %v57_v54  ;;  %3879 = vmatpush3.bf16.msra.mxu1 %v4456_v55  ;;  %v3938_v54 = vpack.c.bf16 %v684_v53, %v683_v52 }
 0x103   :  { %3155 = vmatprep.mubr.msk.f32.mxu0 %vm4271_vm0, %v4272_v4  ;;  %3907 = vmatprep.subr.bf16.mxu0 %v4270_v0 }
 0x104   :  { %3084 = vmatmul.mubr.msk.f32.gmra.mrb[4].mxu1 %vm196_vm2, %v58_v58  ;;  %3909 = vmatpush3.bf16.msra.mxu0 %v4456_v55 }
 0x105   :  { %3086 = vmatprep.mubr.msk.f32.mxu1 %vm4271_vm0, %v4272_v4  ;;  %3880 = vmatprep.subr.bf16.mxu1 %v4270_v0 }
 0x106   :  { %3156 = vmatmul.mubr.msk.f32.gmra.mrb[14].mxu0 %vm196_vm2, %v58_v58  ;;  %3882 = vmatpush3.bf16.msra.mxu1 %v4477_v59  ;;  %v3941_v58 = vpack.c.bf16 %v686_v57, %v685_v56  ;;  %v4651_v57 = vrot.slane %v4398_v22, %v609_v44 }
 0x107   :  { %3158 = vmatprep.mubr.msk.f32.mxu0 %vm4271_vm0, %v4272_v4  ;;  %3910 = vmatprep.subr.bf16.mxu0 %v4270_v0 }
 0x108   :  { %3087 = vmatmul.mubr.msk.f32.gmra.mrb[6].mxu1 %vm196_vm2, %v59_v62  ;;  %3912 = vmatpush3.bf16.msra.mxu0 %v4477_v59 }
 0x109   :  { %3089 = vmatprep.mubr.msk.f32.mxu1 %vm4271_vm0, %v4272_v4  ;;  %3883 = vmatprep.subr.bf16.mxu1 %v4270_v0 }
 0x10a   :  { %3159 = vmatmul.mubr.msk.f32.gmra.mrb[16].mxu0 %vm196_vm2, %v59_v62  ;;  %3885 = vmatpush3.bf16.msra.mxu1 %v4498_v63  ;;  %v3944_v62 = vpack.c.bf16 %v688_v61, %v687_v60 }
 0x10b   :  { %3161 = vmatprep.mubr.msk.f32.mxu0 %vm4271_vm0, %v4272_v4  ;;  %3913 = vmatprep.subr.bf16.mxu0 %v4270_v0 }
 0x10c   :  { %3090 = vmatmul.mubr.msk.f32.gmra.mrb[8].mxu1 %vm196_vm2, %v60_v3  ;;  %3915 = vmatpush3.bf16.msra.mxu0 %v4498_v63 }
 0x10d   :  { %3886 = vmatprep.subr.bf16.mxu1 %v4270_v0  ;;  %3916 = vmatprep.subr.bf16.mxu0 %v4270_v0 }
 0x10e   :  { %3162 = vmatmul.mubr.msk.f32.gmra.mrb[18].mxu0 %vm196_vm2, %v60_v3  ;;  %3888 = vmatpush3.bf16.msra.mxu1 %v4519_v5  ;;  %v3947_v3 = vpack.c.bf16 %v690_v2, %v689_v1 }
 0x10f   :  { %3889 = vmatprep.subr.bf16.mxu1 %v4270_v0  ;;  %3124 = vmatprep.mubr.msk.f32.mxu1 %vm4271_vm0, %v4272_v4 }
 0x110   :  { %3918 = vmatpush3.bf16.msra.mxu0 %v4519_v5  ;;  %3196 = vmatprep.mubr.msk.f32.mxu0 %vm4271_vm0, %v4272_v4 }
 0x111   :  { %3919 = vmatprep.subr.bf16.mxu0 %v4270_v0 }
 0x112   :  { %3891 = vmatpush3.bf16.msra.mxu1 %v4536_v8 }
 0x113   :  { %3892 = vmatprep.subr.bf16.mxu1 %v4270_v0 }
 0x114   :  { %3921 = vmatpush3.bf16.msra.mxu0 %v4536_v8 }
 0x115   :  { %3922 = vmatprep.subr.bf16.mxu0 %v4270_v0 }
 0x116   :  { %3894 = vmatpush3.bf16.msra.mxu1 %v4552_v11 }
 0x117   :  { %3895 = vmatprep.subr.bf16.mxu1 %v4270_v0 }
 0x118   :  { %3924 = vmatpush3.bf16.msra.mxu0 %v4552_v11 }
 0x119   :  { %3925 = vmatprep.subr.bf16.mxu0 %v4270_v0 }
 0x11a   :  { %3897 = vmatpush3.bf16.msra.mxu1 %v4564_v14 }
 0x11b   :  { %3928 = vmatprep.subr.bf16.mxu1 %v4270_v0 }
 0x11c   :  { %3927 = vmatpush3.bf16.msra.mxu0 %v4564_v14 }
 0x11d   :  { %3952 = vmatprep.subr.bf16.mxu0 %v4270_v0 }
 0x1cf   :  { %v278_v18 = vpop.f32.mrb[0].mxu1 }
 0x1d0   :  { %v3079_v19 = vpop.f32.mrb[1].mxu1  ;;  %3125 = vmatmul.mubr.f32.vlgmr.msra.gmra.mrb[10].mxu1 %v278_v18 }
 0x1d1   :  { %v468_v21 = vpop.f32.mrb[10].mxu0  ;;  %3127 = vmatprep.mubr.msk.f32.mxu1 %vm4271_vm0, %v4272_v4  ;;  %3930 = vmatpush3.bf16.msra.mxu1 %v3929_v17 }
 0x1d2   :  { %v3151_v23 = vpop.f32.mrb[11].mxu0  ;;  %3197 = vmatmul.mubr.f32.vlgmr.msra.gmra.mrb[20].mxu0 %v468_v21  ;;  %3931 = vmatprep.subr.bf16.mxu1 %v4270_v0 }
 0x1d3   :  { %v283_v24 = vpop.f32.mrb[2].mxu1  ;;  %3199 = vmatprep.mubr.msk.f32.mxu0 %vm4271_vm0, %v4272_v4 }
 0x1d4   :  { %v3082_v25 = vpop.f32.mrb[3].mxu1  ;;  %3128 = vmatmul.mubr.f32.gmra.mrb[12].mxu1 %v283_v24 }
 0x1d5   :  { %v473_v27 = vpop.f32.mrb[12].mxu0  ;;  %3130 = vmatprep.mubr.msk.f32.mxu1 %vm4271_vm0, %v4272_v4  ;;  %3933 = vmatpush3.bf16.msra.mxu1 %v3932_v47 }
 0x1d6   :  { %v3154_v29 = vpop.f32.mrb[13].mxu0  ;;  %3200 = vmatmul.mubr.f32.gmra.mrb[22].mxu0 %v473_v27  ;;  %3934 = vmatprep.subr.bf16.mxu1 %v4270_v0 }
 0x1d7   :  { %v288_v30 = vpop.f32.mrb[4].mxu1  ;;  %3202 = vmatprep.mubr.msk.f32.mxu0 %vm4271_vm0, %v4272_v4 }
 0x1d8   :  { %v3085_v31 = vpop.f32.mrb[5].mxu1  ;;  %3131 = vmatmul.mubr.f32.gmra.mrb[14].mxu1 %v288_v30 }
 0x1d9   :  { %v478_v32 = vpop.f32.mrb[14].mxu0  ;;  %3133 = vmatprep.mubr.msk.f32.mxu1 %vm4271_vm0, %v4272_v4  ;;  %3936 = vmatpush3.bf16.msra.mxu1 %v3935_v50 }
 0x1da   :  { %v3157_v33 = vpop.f32.mrb[15].mxu0  ;;  %3203 = vmatmul.mubr.f32.gmra.mrb[24].mxu0 %v478_v32  ;;  %3937 = vmatprep.subr.bf16.mxu1 %v4270_v0 }
 0x1db   :  { %v293_v34 = vpop.f32.mrb[6].mxu1  ;;  %3205 = vmatprep.mubr.msk.f32.mxu0 %vm4271_vm0, %v4272_v4 }
 0x1dc   :  { %v3088_v35 = vpop.f32.mrb[7].mxu1  ;;  %3134 = vmatmul.mubr.f32.gmra.mrb[16].mxu1 %v293_v34 }
 0x1dd   :  { %v483_v37 = vpop.f32.mrb[16].mxu0  ;;  %3136 = vmatprep.mubr.msk.f32.mxu1 %vm4271_vm0, %v4272_v4  ;;  %3939 = vmatpush3.bf16.msra.mxu1 %v3938_v54 }
 0x1de   :  { %v3160_v39 = vpop.f32.mrb[17].mxu0  ;;  %3206 = vmatmul.mubr.f32.gmra.mrb[26].mxu0 %v483_v37  ;;  %3940 = vmatprep.subr.bf16.mxu1 %v4270_v0 }
 0x1df   :  { %v298_v40 = vpop.f32.mrb[8].mxu1  ;;  %3208 = vmatprep.mubr.msk.f32.mxu0 %vm4271_vm0, %v4272_v4 }
 0x1e0   :  { %3137 = vmatmul.mubr.f32.gmra.mrb[18].mxu1 %v298_v40  ;;  %v3091_v41 = vpop.f32.mrb[9].mxu1 }
 0x1e1   :  { %v488_v42 = vpop.f32.mrb[18].mxu0  ;;  %3243 = vmatprep.mubr.msk.f32.mxu1 %vm4271_vm0, %v4272_v4  ;;  %3942 = vmatpush3.bf16.msra.mxu1 %v3941_v58  ;;  %v628_v58 = vsub.s32 2, %v4392_v20 }
 0x1e2   :  { %3209 = vmatmul.mubr.f32.gmra.mrb[28].mxu0 %v488_v42  ;;  %v3163_v43 = vpop.f32.mrb[19].mxu0  ;;  %3943 = vmatprep.subr.bf16.mxu1 %v4270_v0 }
 0x1e3   :  { %3268 = vmatprep.mubr.msk.f32.mxu0 %vm4271_vm0, %v4272_v4 }
 0x1e5   :  { %3945 = vmatpush3.bf16.msra.mxu1 %v3944_v62 }
 0x1e6   :  { %3946 = vmatprep.subr.bf16.mxu1 %v4270_v0 }
 0x1e9   :  { %3948 = vmatpush3.bf16.msra.mxu1 %v3947_v3 }
 0x1ea   :  { %3949 = vmatprep.subr.bf16.mxu1 %v4270_v0 }
 0x1ed   :  { %3951 = vmatpush3.bf16.msra.mxu1 %v3950_v9 }
 0x1ee   :  { %3958 = vmatprep.subr.bf16.mxu1 %v4270_v0 }
 0x2a3   :  { %v368_v10 = vpop.f32.mrb[10].mxu1 }
 0x2a4   :  { %v392_v12 = vmul.f32 0.0625, %v368_v10  ;;  %v3126_v13 = vpop.f32.mrb[11].mxu1 }
 0x2a5   :  { %v558_v15 = vpop.f32.mrb[20].mxu0  ;;  %v4660_v13 = vrot.slane %v4398_v22, %v628_v58 }
 0x2a6   :  { %v587_v16 = vmul.f32 %v392_v12, %v392_v12  ;;  %v582_v17 = vmul.f32 0.0625, %v558_v15  ;;  %v3198_v18 = vpop.f32.mrb[21].mxu0 }
 0x2a7   :  { %v373_v19 = vpop.f32.mrb[12].mxu1 }
 0x2a8   :  { %v592_v21 = vsub.f32 %v582_v17, %v587_v16  ;;  %v393_v23 = vmul.f32 0.0625, %v373_v19  ;;  %v3129_v24 = vpop.f32.mrb[13].mxu1 }
 0x2a9   :  { %v563_v25 = vpop.f32.mrb[22].mxu0  ;;  %v2603_v24 = vld [vmem:[%s5505_s2 + $0x80] sm:$0xff] }
 0x2aa   :  { %v597_v27 = vadd.f32 1e-05, %v592_v21  ;;  %v588_v29 = vmul.f32 %v393_v23, %v393_v23  ;;  %v583_v30 = vmul.f32 0.0625, %v563_v25  ;;  %v3201_v31 = vpop.f32.mrb[23].mxu0  ;;  %v2604_v25 = vld [vmem:[%s5505_s2 + $0x88] sm:$0xff] }
 0x2ab   :  { %v378_v32 = vpop.f32.mrb[14].mxu1 }
 0x2ac   :  { %4213 = vrsqrt.f32 %v597_v27  ;;  %v593_v33 = vsub.f32 %v583_v30, %v588_v29  ;;  %v394_v34 = vmul.f32 0.0625, %v378_v32  ;;  %v3132_v35 = vpop.f32.mrb[15].mxu1  ;;  %v3959_v30 = vpack.c.bf16 %v2604_v25, %v2603_v24  ;;  %v2616_v24 = vld [vmem:[%s5505_s2 + $0xe8] sm:$0xff] }
 0x2ad   :  { %v568_v37 = vpop.f32.mrb[24].mxu0  ;;  %v2606_v35 = vld [vmem:[%s5505_s2 + $0x98] sm:$0xff] }
 0x2ae   :  { %v598_v39 = vadd.f32 1e-05, %v593_v33  ;;  %v589_v40 = vmul.f32 %v394_v34, %v394_v34  ;;  %v584_v41 = vmul.f32 0.0625, %v568_v37  ;;  %v3204_v42 = vpop.f32.mrb[25].mxu0  ;;  %v2605_v33 = vld [vmem:[%s5505_s2 + $0x90] sm:$0xff] }
 0x2af   :  { %v383_v43 = vpop.f32.mrb[16].mxu1 }
 0x2b0   :  { %4215 = vrsqrt.f32 %v598_v39  ;;  %v594_v46 = vsub.f32 %v584_v41, %v589_v40  ;;  %v395_v47 = vmul.f32 0.0625, %v383_v43  ;;  %v3135_v48 = vpop.f32.mrb[17].mxu1 }
 0x2b1   :  { %v573_v49 = vpop.f32.mrb[26].mxu0 }
 0x2b2   :  { %v599_v50 = vadd.f32 1e-05, %v594_v46  ;;  %v590_v52 = vmul.f32 %v395_v47, %v395_v47  ;;  %v585_v53 = vmul.f32 0.0625, %v573_v49  ;;  %v3207_v54 = vpop.f32.mrb[27].mxu0  ;;  %v2607_v46 = vld [vmem:[%s5505_s2 + $0xa0] sm:$0xff] }
 0x2b3   :  { %v388_v56 = vpop.f32.mrb[18].mxu1 }
 0x2b4   :  { %4217 = vrsqrt.f32 %v599_v50  ;;  %v595_v60 = vsub.f32 %v585_v53, %v590_v52  ;;  %v4654_v61 = vmul.f32 0.0625, %v388_v56  ;;  %v3138_v62 = vpop.f32.mrb[19].mxu1 }
 0x2b5   :  { %v578_v1 = vpop.f32.mrb[28].mxu0 }
 0x2b6   :  { %v4214_v2 = vpop.eup %4213  ;;  %v600_v3 = vadd.f32 1e-05, %v595_v60  ;;  %v591_v6 = vmul.f32 %v4654_v61, %v4654_v61  ;;  %v586_v7 = vmul.f32 0.0625, %v578_v1  ;;  %v3210_v9 = vpop.f32.mrb[29].mxu0  ;;  %v2609_v60 = vld [vmem:[%s5505_s2 + $0xb0] sm:$0xff] }
 0x2b7   :  { %v611_v10 = vmul.f32 %v4214_v2, %v4651_v57  ;;  %v2611_v9 = vld [vmem:[%s5505_s2 + $0xc0] sm:$0xff] }
 0x2b8   :  { %4219 = vrsqrt.f32 %v600_v3  ;;  %v596_v15 = vsub.f32 %v586_v7, %v591_v6 }
 0x2b9   :  { %v621_v16 = vmul.f32 %v611_v10, %v392_v12  ;;  %v616_v19 = vmul.f32 %v611_v10, %v4401_v26 }
 0x2ba   :  { %v4216_v17 = vpop.eup %4215  ;;  %v601_v18 = vadd.f32 1e-05, %v596_v15 }
 0x2bb   :  { %v630_v21 = vsub.f32 %v4660_v13, %v621_v16  ;;  %v612_v22 = vmul.f32 %v4216_v17, %v4651_v57  ;;  %v2613_v16 = vld [vmem:[%s5505_s2 + $0xd0] sm:$0xff]  ;;  %v2614_v17 = vld [vmem:[%s5505_s2 + $0xd8] sm:$0xff] }
 0x2bc   :  { %4221 = vrsqrt.f32 %v601_v18 }
 0x2bd   :  { %v635_v27 = vadd.f32 %v630_v21, %v616_v19  ;;  %v622_v29 = vmul.f32 %v612_v22, %v393_v23  ;;  %v617_v31 = vmul.f32 %v612_v22, %v4403_v28  ;;  %v3962_v28 = vpack.c.bf16 %v2606_v35, %v2605_v33  ;;  %v2615_v21 = vld [vmem:[%s5505_s2 + $0xe0] sm:$0xff]  ;;  %v2617_v22 = vld [vmem:[%s5505_s2 + $0xf0] sm:$0xff] }
 0x2be   :  { %v4218_v12 = vpop.eup %4217  ;;  %v3974_v19 = vpack.c.bf16 %v2614_v17, %v2613_v16  ;;  %v3977_v25 = vpack.c.bf16 %v2616_v24, %v2615_v21  ;;  %v2641_v16 = vld [vmem:[%s5505_s2 + $0x160] sm:$0xff]  ;;  %v2642_v17 = vld [vmem:[%s5505_s2 + $0x168] sm:$0xff] }
 0x2bf   :  { %vm640_vm3 = vcmp.ge.f32.partialorder %v635_v27, 0.0  ;;  %v645_v26 = vmul.f32 0.01, %v635_v27  ;;  %v631_v32 = vsub.f32 %v4660_v13, %v622_v29  ;;  %v613_v37 = vmul.f32 %v4218_v12, %v4651_v57 }
 0x2c0   :  { %v4001_v24 = vpack.c.bf16 %v2642_v17, %v2641_v16 }
 0x2c1   :  { %v4680_v39 = vsel %vm640_vm3, %v635_v27, %v645_v26  ;;  %v636_v23 = vadd.f32 %v631_v32, %v617_v31  ;;  %v623_v40 = vmul.f32 %v613_v37, %v394_v34  ;;  %v618_v42 = vmul.f32 %v613_v37, %v4412_v36  ;;  %v2608_v34 = vld [vmem:[%s5505_s2 + $0xa8] sm:$0xff]  ;;  %v2618_v27 = vld [vmem:[%s5505_s2 + $0xf8] sm:$0xff] }
 0x2c2   :  { %v4220_v41 = vpop.eup %4219  ;;  %3244 = vmatmul.mubr.f32.vlgmr.msra.gmra.mrb[20].mxu1 %v4680_v39  ;;  %v3965_v53 = vpack.c.bf16 %v2608_v34, %v2607_v46  ;;  %v3980_v29 = vpack.c.bf16 %v2618_v27, %v2617_v22  ;;  %v2631_v34 = vld [vmem:[%s5505_s2 + $0x110] sm:$0xff]  ;;  %v2644_v22 = vld [vmem:[%s5505_s2 + $0x178] sm:$0xff] }
 0x2c3   :  { %3960 = vmatpush3.bf16.msra.mxu1 %v3959_v30  ;;  %3246 = vmatprep.mubr.msk.f32.mxu1 %vm4271_vm0, %v4272_v4  ;;  %vm641_vm4 = vcmp.ge.f32.partialorder %v636_v23, 0.0  ;;  %v646_v43 = vmul.f32 0.01, %v636_v23  ;;  %v632_v44 = vsub.f32 %v4660_v13, %v623_v40  ;;  %v614_v48 = vmul.f32 %v4220_v41, %v4651_v57  ;;  %v2629_v41 = vld [vmem:[%s5505_s2 + $0x100] sm:$0xff] }
 0x2c4   :  { %3961 = vmatprep.subr.bf16.mxu1 %v4270_v0 }
 0x2c5   :  { %v4695_v36 = vsel %vm641_vm4, %v636_v23, %v646_v43  ;;  %v637_v49 = vadd.f32 %v632_v44, %v618_v42  ;;  %v624_v50 = vmul.f32 %v614_v48, %v395_v47  ;;  %v619_v54 = vmul.f32 %v614_v48, %v4415_v38  ;;  %v2610_v47 = vld [vmem:[%s5505_s2 + $0xb8] sm:$0xff]  ;;  %v672_v44 = vld [vmem:[%s5506_s3] sm:$0xff] }
 0x2c6   :  { %v4222_v52 = vpop.eup %4221  ;;  %3247 = vmatmul.mubr.f32.gmra.mrb[22].mxu1 %v4695_v36  ;;  %v3968_v3 = vpack.c.bf16 %v2610_v47, %v2609_v60  ;;  %v2632_v48 = vld [vmem:[%s5505_s2 + $0x118] sm:$0xff] }
 0x2c7   :  { %3963 = vmatpush3.bf16.msra.mxu1 %v3962_v28  ;;  %3249 = vmatprep.mubr.msk.f32.mxu1 %vm4271_vm0, %v4272_v4  ;;  %vm642_vm5 = vcmp.ge.f32.partialorder %v637_v49, 0.0  ;;  %v647_v56 = vmul.f32 0.01, %v637_v49  ;;  %v633_v58 = vsub.f32 %v4660_v13, %v624_v50  ;;  %v615_v62 = vmul.f32 %v4222_v52, %v4651_v57  ;;  %v2630_v28 = vld [vmem:[%s5505_s2 + $0x108] sm:$0xff]  ;;  %v2633_v52 = vld [vmem:[%s5505_s2 + $0x120] sm:$0xff]  ;;  %v2636_v60 = vld [vmem:[%s5505_s2 + $0x138] sm:$0xff] }
 0x2c8   :  { %3964 = vmatprep.subr.bf16.mxu1 %v4270_v0  ;;  %v3983_v46 = vpack.c.bf16 %v2630_v28, %v2629_v41  ;;  %v3986_v50 = vpack.c.bf16 %v2632_v48, %v2631_v34  ;;  %v675_v47 = vld [vmem:[%s5506_s3 + $0x18] sm:$0xff] }
 0x2c9   :  { %v4710_v38 = vsel %vm642_vm5, %v637_v49, %v647_v56  ;;  %v638_v1 = vadd.f32 %v633_v58, %v619_v54  ;;  %v625_v2 = vmul.f32 %v615_v62, %v4654_v61  ;;  %v620_v7 = vmul.f32 %v615_v62, %v4423_v45  ;;  %v2612_v61 = vld [vmem:[%s5505_s2 + $0xc8] sm:$0xff]  ;;  %v674_v54 = vld [vmem:[%s5506_s3 + $0x10] sm:$0xff] }
 0x2ca   :  { %3250 = vmatmul.mubr.f32.gmra.mrb[24].mxu1 %v4710_v38  ;;  %v673_v49 = vld [vmem:[%s5506_s3 + $0x8] sm:$0xff]  ;;  %v2635_v58 = vld [vmem:[%s5505_s2 + $0x130] sm:$0xff] }
 0x2cb   :  { %3966 = vmatpush3.bf16.msra.mxu1 %v3965_v53  ;;  %3252 = vmatprep.mubr.msk.f32.mxu1 %vm4271_vm0, %v4272_v4  ;;  %vm643_vm6 = vcmp.ge.f32.partialorder %v638_v1, 0.0  ;;  %v648_v6 = vmul.f32 0.01, %v638_v1  ;;  %v634_v57 = vsub.f32 %v4660_v13, %v625_v2  ;;  %v3971_v13 = vpack.c.bf16 %v2612_v61, %v2611_v9  ;;  %v2634_v53 = vld [vmem:[%s5505_s2 + $0x128] sm:$0xff]  ;;  %v2639_v9 = vld [vmem:[%s5505_s2 + $0x150] sm:$0xff]  ;;  %v2640_v61 = vld [vmem:[%s5505_s2 + $0x158] sm:$0xff] }
 0x2cc   :  { %3967 = vmatprep.subr.bf16.mxu1 %v4270_v0  ;;  %v3989_v56 = vpack.c.bf16 %v2634_v53, %v2633_v52  ;;  %v3992_v62 = vpack.c.bf16 %v2636_v60, %v2635_v58  ;;  %v2638_v2 = vld [vmem:[%s5505_s2 + $0x148] sm:$0xff] }
 0x2cd   :  { %v4725_v10 = vsel %vm643_vm6, %v638_v1, %v648_v6  ;;  %v639_v15 = vadd.f32 %v634_v57, %v620_v7  ;;  %v2637_v1 = vld [vmem:[%s5505_s2 + $0x140] sm:$0xff]  ;;  %v2624_v60 = vld [vmem:[%s5506_s3 + $0x28] sm:$0xff] }
 0x2ce   :  { %3253 = vmatmul.mubr.f32.gmra.mrb[26].mxu1 %v4725_v10  ;;  %v676_v7 = vld [vmem:[%s5506_s3 + $0x20] sm:$0xff]  ;;  %v3995_v57 = vpack.c.bf16 %v2638_v2, %v2637_v1  ;;  %v2628_v2 = vld [vmem:[%s5506_s3 + $0x48] sm:$0xff] }
 0x2cf   :  { %3969 = vmatpush3.bf16.msra.mxu1 %v3968_v3  ;;  %3255 = vmatprep.mubr.msk.f32.mxu1 %vm4271_vm0, %v4272_v4  ;;  %vm644_vm7 = vcmp.ge.f32.partialorder %v639_v15, 0.0  ;;  %v649_v45 = vmul.f32 0.01, %v639_v15  ;;  %v2627_v1 = vld [vmem:[%s5506_s3 + $0x40] sm:$0xff] }
 0x2d0   :  { %3970 = vmatprep.subr.bf16.mxu1 %v4270_v0 }
 0x2d1   :  { %v4737_v18 = vsel %vm644_vm7, %v639_v15, %v649_v45 }
 0x2d2   :  { %3256 = vmatmul.mubr.f32.gmra.mrb[28].mxu1 %v4737_v18 }
 0x2d3   :  { %3972 = vmatpush3.bf16.msra.mxu1 %v3971_v13  ;;  %3315 = vmatprep.mubr.msk.f32.mxu1 %vm4271_vm0, %v4272_v4  ;;  %v3998_v13 = vpack.c.bf16 %v2640_v61, %v2639_v9  ;;  %v4941_v9 = vld [vmem:[%s5502_s10] sm:$0xff] }
 0x2d4   :  { %3973 = vmatprep.subr.bf16.mxu1 %v4270_v0 }
 0x2d7   :  { %3975 = vmatpush3.bf16.msra.mxu1 %v3974_v19 }
 0x2d8   :  { %3976 = vmatprep.subr.bf16.mxu1 %v4270_v0 }
 0x2db   :  { %3978 = vmatpush3.bf16.msra.mxu1 %v3977_v25  ;;  %v2643_v25 = vld [vmem:[%s5505_s2 + $0x170] sm:$0xff] }
 0x2dc   :  { %3979 = vmatprep.subr.bf16.mxu1 %v4270_v0 }
 0x2df   :  { %3981 = vmatpush3.bf16.msra.mxu1 %v3980_v29 }
 0x2e0   :  { %4006 = vmatprep.subr.bf16.mxu1 %v4270_v0 }
 0x2e2   :  { %3316 = vmatmul.mubr.f32.vlgmr.msra.gmra.mrb[30].mxu1 %v4680_v39 }
 0x2e3   :  { %3318 = vmatprep.mubr.msk.f32.mxu1 %vm4271_vm0, %v4272_v4 }
 0x2e6   :  { %3319 = vmatmul.mubr.f32.gmra.mrb[32].mxu1 %v4695_v36 }
 0x2e7   :  { %3321 = vmatprep.mubr.msk.f32.mxu1 %vm4271_vm0, %v4272_v4 }
 0x2ea   :  { %3322 = vmatmul.mubr.f32.gmra.mrb[34].mxu1 %v4710_v38 }
 0x2eb   :  { %3324 = vmatprep.mubr.msk.f32.mxu1 %vm4271_vm0, %v4272_v4 }
 0x2ee   :  { %3325 = vmatmul.mubr.f32.gmra.mrb[36].mxu1 %v4725_v10 }
 0x2ef   :  { %3327 = vmatprep.mubr.msk.f32.mxu1 %vm4271_vm0, %v4272_v4 }
 0x2f2   :  { %3328 = vmatmul.mubr.f32.gmra.mrb[38].mxu1 %v4737_v18 }
 0x2f3   :  { %3387 = vmatprep.mubr.msk.f32.mxu1 %vm4271_vm0, %v4272_v4 }
 0x395   :  { %v759_v12 = vpop.f32.mrb[20].mxu1 }
 0x396   :  { %v3245_v30 = vpop.f32.mrb[21].mxu1 }
 0x399   :  { %v764_v31 = vpop.f32.mrb[22].mxu1 }
 0x39a   :  { %v3953_v26 = vpack.c.bf16 %v764_v31, %v759_v12  ;;  %v3248_v32 = vpop.f32.mrb[23].mxu1  ;;  %v4004_v12 = vpack.c.bf16 %v2644_v22, %v2643_v25 }
 0x39c   :  { %3954 = vmatpush3.bf16.msra.mxu0 %v3953_v26 }
 0x39d   :  { %v769_v33 = vpop.f32.mrb[24].mxu1  ;;  %3955 = vmatprep.subr.bf16.mxu0 %v4270_v0 }
 0x39e   :  { %v3251_v35 = vpop.f32.mrb[25].mxu1 }
 0x3a1   :  { %v774_v37 = vpop.f32.mrb[26].mxu1 }
 0x3a2   :  { %v3956_v23 = vpack.c.bf16 %v774_v37, %v769_v33  ;;  %v3254_v40 = vpop.f32.mrb[27].mxu1 }
 0x3a4   :  { %3957 = vmatpush3.bf16.msra.mxu0 %v3956_v23 }
 0x3a5   :  { %v779_v42 = vpop.f32.mrb[28].mxu1  ;;  %3266 = vmatprep.subr.mxu0 %v4272_v4 }
 0x3a6   :  { %v3257_v43 = vpop.f32.mrb[29].mxu1 }
 0x3a8   :  { %3267 = vmatpush3.msra.mxu0 %v779_v42 }
 0x3a9   :  { %3269 = vmatmul.mubr.msk.f32.vlgmr.msra.gmra.mrb[30].mxu0 %vm196_vm2, %v672_v44  ;;  %3982 = vmatprep.subr.bf16.mxu0 %v4270_v0 }
 0x3aa   :  { %3984 = vmatpush3.bf16.msra.mxu0 %v3983_v46  ;;  %3271 = vmatprep.mubr.msk.f32.mxu0 %vm4271_vm0, %v4272_v4 }
 0x3ab   :  { %3985 = vmatprep.subr.bf16.mxu0 %v4270_v0 }
 0x3ad   :  { %3272 = vmatmul.mubr.msk.f32.gmra.mrb[32].mxu0 %vm196_vm2, %v673_v49 }
 0x3ae   :  { %3987 = vmatpush3.bf16.msra.mxu0 %v3986_v50  ;;  %3274 = vmatprep.mubr.msk.f32.mxu0 %vm4271_vm0, %v4272_v4 }
 0x3af   :  { %3988 = vmatprep.subr.bf16.mxu0 %v4270_v0 }
 0x3b1   :  { %3275 = vmatmul.mubr.msk.f32.gmra.mrb[34].mxu0 %vm196_vm2, %v674_v54 }
 0x3b2   :  { %3990 = vmatpush3.bf16.msra.mxu0 %v3989_v56  ;;  %3277 = vmatprep.mubr.msk.f32.mxu0 %vm4271_vm0, %v4272_v4 }
 0x3b3   :  { %3991 = vmatprep.subr.bf16.mxu0 %v4270_v0 }
 0x3b5   :  { %v954_v3 = vpop.f32.mrb[30].mxu1  ;;  %3278 = vmatmul.mubr.msk.f32.gmra.mrb[36].mxu0 %vm196_vm2, %v675_v47  ;;  %v2625_v47 = vld [vmem:[%s5506_s3 + $0x30] sm:$0xff] }
 0x3b6   :  { %v3317_v6 = vpop.f32.mrb[31].mxu1  ;;  %3993 = vmatpush3.bf16.msra.mxu0 %v3992_v62  ;;  %3280 = vmatprep.mubr.msk.f32.mxu0 %vm4271_vm0, %v4272_v4  ;;  %v2626_v62 = vld [vmem:[%s5506_s3 + $0x38] sm:$0xff] }
 0x3b7   :  { %3994 = vmatprep.subr.bf16.mxu0 %v4270_v0 }
 0x3b9   :  { %v959_v15 = vpop.f32.mrb[32].mxu1  ;;  %3281 = vmatmul.mubr.msk.f32.gmra.mrb[38].mxu0 %vm196_vm2, %v676_v7 }
 0x3ba   :  { %v3320_v45 = vpop.f32.mrb[33].mxu1  ;;  %3996 = vmatpush3.bf16.msra.mxu0 %v3995_v57  ;;  %3362 = vmatprep.mubr.msk.f32.mxu0 %vm4271_vm0, %v4272_v4 }
 0x3bb   :  { %3997 = vmatprep.subr.bf16.mxu0 %v4270_v0 }
 0x3bd   :  { %v964_v19 = vpop.f32.mrb[34].mxu1 }
 0x3be   :  { %v3323_v21 = vpop.f32.mrb[35].mxu1  ;;  %3999 = vmatpush3.bf16.msra.mxu0 %v3998_v13 }
 0x3bf   :  { %4000 = vmatprep.subr.bf16.mxu0 %v4270_v0 }
 0x3c1   :  { %v969_v27 = vpop.f32.mrb[36].mxu1 }
 0x3c2   :  { %v3326_v29 = vpop.f32.mrb[37].mxu1  ;;  %4002 = vmatpush3.bf16.msra.mxu0 %v4001_v24 }
 0x3c3   :  { %4003 = vmatprep.subr.bf16.mxu0 %v4270_v0 }
 0x3c5   :  { %v974_v30 = vpop.f32.mrb[38].mxu1 }
 0x3c6   :  { %v3329_v31 = vpop.f32.mrb[39].mxu1  ;;  %4005 = vmatpush3.bf16.msra.mxu0 %v4004_v12 }
 0x3c7   :  { %4012 = vmatprep.subr.bf16.mxu0 %v4270_v0 }
 0x3c9   :  { %3363 = vmatmul.mubr.f32.vlgmr.msra.gmra.mrb[40].mxu0 %v4680_v39 }
 0x3ca   :  { %3365 = vmatprep.mubr.msk.f32.mxu0 %vm4271_vm0, %v4272_v4 }
 0x3cd   :  { %3366 = vmatmul.mubr.f32.gmra.mrb[42].mxu0 %v4695_v36 }
 0x3ce   :  { %3368 = vmatprep.mubr.msk.f32.mxu0 %vm4271_vm0, %v4272_v4 }
 0x3d1   :  { %3369 = vmatmul.mubr.f32.gmra.mrb[44].mxu0 %v4710_v38 }
 0x3d2   :  { %3371 = vmatprep.mubr.msk.f32.mxu0 %vm4271_vm0, %v4272_v4 }
 0x3d5   :  { %3372 = vmatmul.mubr.f32.gmra.mrb[46].mxu0 %v4725_v10 }
 0x3d6   :  { %3374 = vmatprep.mubr.msk.f32.mxu0 %vm4271_vm0, %v4272_v4 }
 0x3d9   :  { %3375 = vmatmul.mubr.f32.gmra.mrb[48].mxu0 %v4737_v18 }
 0x3da   :  { %3412 = vmatprep.mubr.msk.f32.mxu0 %vm4271_vm0, %v4272_v4 }
 0x47c   :  { %v864_v39 = vpop.f32.mrb[30].mxu0 }
 0x47d   :  { %v4877_v36 = vadd.f32 %v954_v3, %v864_v39  ;;  %v3270_v26 = vpop.f32.mrb[31].mxu0  ;;  %v1203_v3 = vsub.s32 3, %v4392_v20 }
 0x47f   :  { %v1204_v61 = vrot.slane %v4941_v9, %v1203_v3 }
 0x480   :  { %v869_v32 = vpop.f32.mrb[32].mxu0 }
 0x481   :  { %v4879_v33 = vadd.f32 %v959_v15, %v869_v32  ;;  %v3273_v38 = vpop.f32.mrb[33].mxu0 }
 0x484   :  { %v874_v35 = vpop.f32.mrb[34].mxu0 }
 0x485   :  { %v4881_v37 = vadd.f32 %v964_v19, %v874_v35  ;;  %v3276_v10 = vpop.f32.mrb[35].mxu0  ;;  %v2578_v35 = vld [vmem:[%s5504_s8 + $0x28] sm:$0xff] }
 0x488   :  { %v879_v23 = vpop.f32.mrb[36].mxu0 }
 0x489   :  { %v4883_v40 = vadd.f32 %v969_v27, %v879_v23  ;;  %v3279_v41 = vpop.f32.mrb[37].mxu0 }
 0x48c   :  { %v884_v18 = vpop.f32.mrb[38].mxu0 }
 0x48d   :  { %v4885_v28 = vadd.f32 %v974_v30, %v884_v18  ;;  %v3282_v42 = vpop.f32.mrb[39].mxu0  ;;  %v2580_v18 = vld [vmem:[%s5504_s8 + $0x38] sm:$0xff] }
 0x48e   :  { %v2581_v42 = vld [vmem:[%s5504_s8 + $0x40] sm:$0xff] }
 0x49c   :  { %v1067_v43 = vpop.f32.mrb[40].mxu0 }
 0x49d   :  { %v3364_v44 = vpop.f32.mrb[41].mxu0 }
 0x4a0   :  { %v1072_v46 = vpop.f32.mrb[42].mxu0 }
 0x4a1   :  { %v4007_v34 = vpack.c.bf16 %v1072_v46, %v1067_v43  ;;  %v3367_v48 = vpop.f32.mrb[43].mxu0  ;;  %v2582_v43 = vld [vmem:[%s5504_s8 + $0x48] sm:$0xff] }
 0x4a3   :  { %4008 = vmatpush3.bf16.msra.mxu1 %v4007_v34 }
 0x4a4   :  { %v1077_v49 = vpop.f32.mrb[44].mxu0  ;;  %4009 = vmatprep.subr.bf16.mxu1 %v4270_v0 }
 0x4a5   :  { %v3370_v50 = vpop.f32.mrb[45].mxu0 }
 0x4a8   :  { %v1082_v52 = vpop.f32.mrb[46].mxu0 }
 0x4a9   :  { %v4010_v53 = vpack.c.bf16 %v1082_v52, %v1077_v49  ;;  %v3373_v54 = vpop.f32.mrb[47].mxu0 }
 0x4ab   :  { %4011 = vmatpush3.bf16.msra.mxu1 %v4010_v53 }
 0x4ac   :  { %v1087_v56 = vpop.f32.mrb[48].mxu0  ;;  %3385 = vmatprep.subr.mxu1 %v4272_v4 }
 0x4ad   :  { %v3376_v58 = vpop.f32.mrb[49].mxu0 }
 0x4af   :  { %3386 = vmatpush3.msra.mxu1 %v1087_v56 }
 0x4b0   :  { %3388 = vmatmul.mubr.msk.f32.vlgmr.msra.gmra.mrb[40].mxu1 %vm196_vm2, %v2624_v60  ;;  %4018 = vmatprep.subr.bf16.mxu1 %v4270_v0 }
 0x4b1   :  { %3390 = vmatprep.mubr.msk.f32.mxu1 %vm4271_vm0, %v4272_v4  ;;  %4020 = vmatpush3.bf16.msra.mxu1 %v4438_v51 }
 0x4b2   :  { %4021 = vmatprep.subr.bf16.mxu1 %v4270_v0 }
 0x4b4   :  { %3391 = vmatmul.mubr.msk.f32.gmra.mrb[42].mxu1 %vm196_vm2, %v2625_v47 }
 0x4b5   :  { %3393 = vmatprep.mubr.msk.f32.mxu1 %vm4271_vm0, %v4272_v4  ;;  %4023 = vmatpush3.bf16.msra.mxu1 %v4456_v55 }
 0x4b6   :  { %4024 = vmatprep.subr.bf16.mxu1 %v4270_v0 }
 0x4b8   :  { %3394 = vmatmul.mubr.msk.f32.gmra.mrb[44].mxu1 %vm196_vm2, %v2626_v62 }
 0x4b9   :  { %3396 = vmatprep.mubr.msk.f32.mxu1 %vm4271_vm0, %v4272_v4  ;;  %4026 = vmatpush3.bf16.msra.mxu1 %v4477_v59 }
 0x4ba   :  { %4027 = vmatprep.subr.bf16.mxu1 %v4270_v0 }
 0x4bc   :  { %3397 = vmatmul.mubr.msk.f32.gmra.mrb[46].mxu1 %vm196_vm2, %v2627_v1 }
 0x4bd   :  { %3399 = vmatprep.mubr.msk.f32.mxu1 %vm4271_vm0, %v4272_v4  ;;  %4029 = vmatpush3.bf16.msra.mxu1 %v4498_v63 }
 0x4be   :  { %4030 = vmatprep.subr.bf16.mxu1 %v4270_v0 }
 0x4c0   :  { %3400 = vmatmul.mubr.msk.f32.gmra.mrb[48].mxu1 %vm196_vm2, %v2628_v2 }
 0x4c1   :  { %4032 = vmatpush3.bf16.msra.mxu1 %v4519_v5  ;;  %3459 = vmatprep.mubr.msk.f32.mxu1 %vm4271_vm0, %v4272_v4 }
 0x4c2   :  { %4033 = vmatprep.subr.bf16.mxu1 %v4270_v0 }
 0x4c5   :  { %4035 = vmatpush3.bf16.msra.mxu1 %v4536_v8 }
 0x4c6   :  { %4036 = vmatprep.subr.bf16.mxu1 %v4270_v0 }
 0x4c9   :  { %4038 = vmatpush3.bf16.msra.mxu1 %v4552_v11 }
 0x4ca   :  { %4039 = vmatprep.subr.bf16.mxu1 %v4270_v0 }
 0x4cd   :  { %4041 = vmatpush3.bf16.msra.mxu1 %v4564_v14 }
 0x4ce   :  { %4048 = vmatprep.subr.bf16.mxu1 %v4270_v0 }
 0x583   :  { %v1172_v6 = vpop.f32.mrb[40].mxu1 }
 0x584   :  { %v1196_v7 = vadd.f32 %v1172_v6, %v4877_v36  ;;  %v3389_v57 = vpop.f32.mrb[41].mxu1 }
 0x586   :  { %v4945_v16 = vadd.f32 %v1204_v61, %v1196_v7 }
 0x587   :  { %v1177_v15 = vpop.f32.mrb[42].mxu1 }
 0x588   :  { %v1197_v45 = vadd.f32 %v1177_v15, %v4879_v33  ;;  %v3392_v13 = vpop.f32.mrb[43].mxu1  ;;  %v1421_v33 = vmul.f32 %v4945_v16, %v4945_v16 }
 0x58a   :  { %v4947_v17 = vadd.f32 %v1204_v61, %v1197_v45 }
 0x58b   :  { %v1182_v19 = vpop.f32.mrb[44].mxu1 }
 0x58c   :  { %v4013_v21 = vpack.c.bf16 %v4947_v17, %v4945_v16  ;;  %v1198_v24 = vadd.f32 %v1182_v19, %v4881_v37  ;;  %v3395_v25 = vpop.f32.mrb[45].mxu1  ;;  %v1422_v32 = vmul.f32 %v4947_v17, %v4947_v17 }
 0x58e   :  { %4014 = vmatpush3.bf16.msra.mxu0 %v4013_v21  ;;  %v4954_v12 = vadd.f32 %v1204_v61, %v1198_v24  ;;  %v4043_v10 = vpack.c.bf16 %v1422_v32, %v1421_v33 }
 0x58f   :  { %v1187_v22 = vpop.f32.mrb[46].mxu1  ;;  %4015 = vmatprep.subr.bf16.mxu0 %v4270_v0 }
 0x590   :  { %v1199_v27 = vadd.f32 %v1187_v22, %v4883_v40  ;;  %v3398_v29 = vpop.f32.mrb[47].mxu1  ;;  %v1423_v23 = vmul.f32 %v4954_v12, %v4954_v12  ;;  %v2579_v40 = vld [vmem:[%s5504_s8 + $0x30] sm:$0xff] }
 0x592   :  { %v4956_v30 = vadd.f32 %v1204_v61, %v1199_v27 }
 0x593   :  { %v1192_v31 = vpop.f32.mrb[48].mxu1 }
 0x594   :  { %v4016_v39 = vpack.c.bf16 %v4956_v30, %v4954_v12  ;;  %v1200_v36 = vadd.f32 %v1192_v31, %v4885_v28  ;;  %v3401_v26 = vpop.f32.mrb[49].mxu1  ;;  %v1424_v37 = vmul.f32 %v4956_v30, %v4956_v30 }
 0x596   :  { %4017 = vmatpush3.bf16.msra.mxu0 %v4016_v39  ;;  %v4966_v38 = vadd.f32 %v1204_v61, %v1200_v36  ;;  %v4046_v41 = vpack.c.bf16 %v1424_v37, %v1423_v23 }
 0x597   :  { %3410 = vmatprep.subr.mxu0 %v4272_v4 }
 0x598   :  { %v1425_v28 = vmul.f32 %v4966_v38, %v4966_v38 }
 0x59a   :  { %3411 = vmatpush3.msra.mxu0 %v4966_v38 }
 0x59b   :  { %3413 = vmatmul.mubr.msk.f32.vlgmr.msra.gmra.mrb[50].mxu0 %vm196_vm2, %v2578_v35  ;;  %4042 = vmatprep.subr.bf16.mxu0 %v4270_v0 }
 0x59c   :  { %4044 = vmatpush3.bf16.msra.mxu0 %v4043_v10  ;;  %3415 = vmatprep.mubr.msk.f32.mxu0 %vm4271_vm0, %v4272_v4 }
 0x59d   :  { %4045 = vmatprep.subr.bf16.mxu0 %v4270_v0 }
 0x59f   :  { %3416 = vmatmul.mubr.msk.f32.gmra.mrb[52].mxu0 %vm196_vm2, %v2579_v40 }
 0x5a0   :  { %4047 = vmatpush3.bf16.msra.mxu0 %v4046_v41  ;;  %3418 = vmatprep.mubr.msk.f32.mxu0 %vm4271_vm0, %v4272_v4 }
 0x5a1   :  { %3482 = vmatprep.subr.mxu0 %v4272_v4 }
 0x5a3   :  { %3419 = vmatmul.mubr.msk.f32.gmra.mrb[54].mxu0 %vm196_vm2, %v2580_v18 }
 0x5a4   :  { %3483 = vmatpush3.msra.mxu0 %v1425_v28  ;;  %3421 = vmatprep.mubr.msk.f32.mxu0 %vm4271_vm0, %v4272_v4 }
 0x5a5   :  { %4072 = vmatprep.subr.bf16.mxu0 %v4270_v0 }
 0x5a7   :  { %3422 = vmatmul.mubr.msk.f32.gmra.mrb[56].mxu0 %vm196_vm2, %v2581_v42 }
 0x5a8   :  { %3424 = vmatprep.mubr.msk.f32.mxu0 %vm4271_vm0, %v4272_v4 }
 0x5ab   :  { %3425 = vmatmul.mubr.msk.f32.gmra.mrb[58].mxu0 %vm196_vm2, %v2582_v43 }
 0x5ac   :  { %3484 = vmatprep.mubr.msk.f32.mxu0 %vm4271_vm0, %v4272_v4 }
 0x5af   :  { %3485 = vmatmul.mubr.msk.f32.vlgmr.msra.gmra.mrb[60].mxu0 %vm196_vm2, %v2578_v35 }
 0x5b0   :  { %3487 = vmatprep.mubr.msk.f32.mxu0 %vm4271_vm0, %v4272_v4 }
 0x5b3   :  { %3488 = vmatmul.mubr.msk.f32.gmra.mrb[62].mxu0 %vm196_vm2, %v2579_v40 }
 0x5b4   :  { %3490 = vmatprep.mubr.msk.f32.mxu0 %vm4271_vm0, %v4272_v4 }
 0x5b7   :  { %3491 = vmatmul.mubr.msk.f32.gmra.mrb[64].mxu0 %vm196_vm2, %v2580_v18 }
 0x5b8   :  { %3493 = vmatprep.mubr.msk.f32.mxu0 %vm4271_vm0, %v4272_v4 }
 0x5bb   :  { %3494 = vmatmul.mubr.msk.f32.gmra.mrb[66].mxu0 %vm196_vm2, %v2581_v42 }
 0x5bc   :  { %3496 = vmatprep.mubr.msk.f32.mxu0 %vm4271_vm0, %v4272_v4 }
 0x5bf   :  { %3497 = vmatmul.mubr.msk.f32.gmra.mrb[68].mxu0 %vm196_vm2, %v2582_v43 }
 0x5c0   :  { %3556 = vmatprep.mubr.msk.f32.mxu0 %vm4271_vm0, %v4272_v4 }
 0x66e   :  { %v1302_v44 = vpop.f32.mrb[50].mxu0 }
 0x66f   :  { %v3414_v46 = vpop.f32.mrb[51].mxu0  ;;  %3460 = vmatmul.mubr.f32.vlgmr.msra.gmra.mrb[50].mxu1 %v1302_v44 }
 0x670   :  { %4050 = vmatpush3.bf16.msra.mxu1 %v4438_v51  ;;  %3462 = vmatprep.mubr.msk.f32.mxu1 %vm4271_vm0, %v4272_v4 }
 0x671   :  { %4051 = vmatprep.subr.bf16.mxu1 %v4270_v0 }
 0x672   :  { %v1307_v34 = vpop.f32.mrb[52].mxu0 }
 0x673   :  { %v3417_v48 = vpop.f32.mrb[53].mxu0  ;;  %3463 = vmatmul.mubr.f32.gmra.mrb[52].mxu1 %v1307_v34 }
 0x674   :  { %4053 = vmatpush3.bf16.msra.mxu1 %v4456_v55  ;;  %3465 = vmatprep.mubr.msk.f32.mxu1 %vm4271_vm0, %v4272_v4 }
 0x675   :  { %4054 = vmatprep.subr.bf16.mxu1 %v4270_v0 }
 0x676   :  { %v1312_v49 = vpop.f32.mrb[54].mxu0 }
 0x677   :  { %v3420_v50 = vpop.f32.mrb[55].mxu0  ;;  %3466 = vmatmul.mubr.f32.gmra.mrb[54].mxu1 %v1312_v49 }
 0x678   :  { %4056 = vmatpush3.bf16.msra.mxu1 %v4477_v59  ;;  %3468 = vmatprep.mubr.msk.f32.mxu1 %vm4271_vm0, %v4272_v4 }
 0x679   :  { %4057 = vmatprep.subr.bf16.mxu1 %v4270_v0 }
 0x67a   :  { %v1317_v52 = vpop.f32.mrb[56].mxu0 }
 0x67b   :  { %v3423_v53 = vpop.f32.mrb[57].mxu0  ;;  %3469 = vmatmul.mubr.f32.gmra.mrb[56].mxu1 %v1317_v52 }
 0x67c   :  { %4059 = vmatpush3.bf16.msra.mxu1 %v4498_v63  ;;  %3471 = vmatprep.mubr.msk.f32.mxu1 %vm4271_vm0, %v4272_v4 }
 0x67d   :  { %4060 = vmatprep.subr.bf16.mxu1 %v4270_v0 }
 0x67e   :  { %v1322_v54 = vpop.f32.mrb[58].mxu0 }
 0x67f   :  { %v3426_v56 = vpop.f32.mrb[59].mxu0  ;;  %3472 = vmatmul.mubr.f32.gmra.mrb[58].mxu1 %v1322_v54 }
 0x680   :  { %4062 = vmatpush3.bf16.msra.mxu1 %v4519_v5  ;;  %3531 = vmatprep.mubr.msk.f32.mxu1 %vm4271_vm0, %v4272_v4 }
 0x681   :  { %4063 = vmatprep.subr.bf16.mxu1 %v4270_v0 }
 0x682   :  { %v1492_v58 = vpop.f32.mrb[60].mxu0 }
 0x683   :  { %v3486_v60 = vpop.f32.mrb[61].mxu0 }
 0x684   :  { %4065 = vmatpush3.bf16.msra.mxu1 %v4536_v8  ;;  %v1210_v60 = vld [vmem:[%s5507_s9] sm:$0xff] }
 0x685   :  { %4066 = vmatprep.subr.bf16.mxu1 %v4270_v0 }
 0x686   :  { %v1497_v47 = vpop.f32.mrb[62].mxu0 }
 0x687   :  { %v3489_v62 = vpop.f32.mrb[63].mxu0 }
 0x688   :  { %4068 = vmatpush3.bf16.msra.mxu1 %v4552_v11 }
 0x689   :  { %4069 = vmatprep.subr.bf16.mxu1 %v4270_v0 }
 0x68a   :  { %v1502_v1 = vpop.f32.mrb[64].mxu0 }
 0x68b   :  { %v3492_v2 = vpop.f32.mrb[65].mxu0 }
 0x68c   :  { %4071 = vmatpush3.bf16.msra.mxu1 %v4564_v14 }
 0x68d   :  { %4102 = vmatprep.subr.bf16.mxu1 %v4270_v0 }
 0x68e   :  { %v1507_v3 = vpop.f32.mrb[66].mxu0 }
 0x68f   :  { %3532 = vmatmul.mubr.f32.vlgmr.msra.gmra.mrb[60].mxu1 %v1492_v58  ;;  %v3495_v6 = vpop.f32.mrb[67].mxu0 }
 0x690   :  { %3534 = vmatprep.mubr.msk.f32.mxu1 %vm4271_vm0, %v4272_v4 }
 0x692   :  { %v1512_v7 = vpop.f32.mrb[68].mxu0 }
 0x693   :  { %3535 = vmatmul.mubr.f32.gmra.mrb[62].mxu1 %v1497_v47  ;;  %v3498_v57 = vpop.f32.mrb[69].mxu0 }
 0x694   :  { %3537 = vmatprep.mubr.msk.f32.mxu1 %vm4271_vm0, %v4272_v4 }
 0x697   :  { %3538 = vmatmul.mubr.f32.gmra.mrb[64].mxu1 %v1502_v1 }
 0x698   :  { %3540 = vmatprep.mubr.msk.f32.mxu1 %vm4271_vm0, %v4272_v4 }
 0x69b   :  { %3541 = vmatmul.mubr.f32.gmra.mrb[66].mxu1 %v1507_v3 }
 0x69c   :  { %3543 = vmatprep.mubr.msk.f32.mxu1 %vm4271_vm0, %v4272_v4 }
 0x69f   :  { %3544 = vmatmul.mubr.f32.gmra.mrb[68].mxu1 %v1512_v7 }
 0x6a0   :  { %3650 = vmatprep.mubr.msk.f32.mxu1 %vm4271_vm0, %v4272_v4 }
 0x742   :  { %v1392_v61 = vpop.f32.mrb[50].mxu1 }
 0x743   :  { %v3461_v15 = vpop.f32.mrb[51].mxu1  ;;  %v1416_v29 = vmul.f32 0.0625, %v1392_v61  ;;  %v1211_v61 = vld [vmem:[%s5507_s9 + $0x8] sm:$0xff] }
 0x744   :  { %v2650_v15 = vld [vmem:[%s5507_s9 + $0x28] sm:$0xff] }
 0x745   :  { %v1611_v39 = vmul.f32 %v1416_v29, %v1416_v29 }
 0x746   :  { %v1397_v45 = vpop.f32.mrb[52].mxu1 }
 0x747   :  { %v3464_v13 = vpop.f32.mrb[53].mxu1  ;;  %v1417_v36 = vmul.f32 0.0625, %v1397_v45 }
 0x749   :  { %v1612_v37 = vmul.f32 %v1417_v36, %v1417_v36 }
 0x74a   :  { %v1402_v19 = vpop.f32.mrb[54].mxu1 }
 0x74b   :  { %v3467_v21 = vpop.f32.mrb[55].mxu1  ;;  %v1418_v10 = vmul.f32 0.0625, %v1402_v19 }
 0x74d   :  { %v1613_v42 = vmul.f32 %v1418_v10, %v1418_v10 }
 0x74e   :  { %v1407_v24 = vpop.f32.mrb[56].mxu1 }
 0x74f   :  { %v3470_v25 = vpop.f32.mrb[57].mxu1  ;;  %v1419_v43 = vmul.f32 0.0625, %v1407_v24 }
 0x751   :  { %v1614_v50 = vmul.f32 %v1419_v43, %v1419_v43 }
 0x752   :  { %v1412_v22 = vpop.f32.mrb[58].mxu1 }
 0x753   :  { %v3473_v27 = vpop.f32.mrb[59].mxu1  ;;  %v1420_v52 = vmul.f32 0.0625, %v1412_v22  ;;  %v2651_v22 = vld [vmem:[%s5507_s9 + $0x30] sm:$0xff] }
 0x754   :  { %v1212_v27 = vld [vmem:[%s5507_s9 + $0x10] sm:$0xff] }
 0x755   :  { %v1615_v1 = vmul.f32 %v1420_v52, %v1420_v52 }
 0x762   :  { %v1582_v31 = vpop.f32.mrb[60].mxu1 }
 0x763   :  { %v1606_v26 = vmul.f32 0.0625, %v1582_v31  ;;  %v3533_v32 = vpop.f32.mrb[61].mxu1 }
 0x765   :  { %v1616_v33 = vsub.f32 %v1606_v26, %v1611_v39 }
 0x766   :  { %v1587_v35 = vpop.f32.mrb[62].mxu1 }
 0x767   :  { %v1621_v23 = vadd.f32 1e-05, %v1616_v33  ;;  %v1607_v40 = vmul.f32 0.0625, %v1587_v35  ;;  %v3536_v41 = vpop.f32.mrb[63].mxu1  ;;  %v2652_v35 = vld [vmem:[%s5507_s9 + $0x38] sm:$0xff] }
 0x769   :  { %4223 = vrsqrt.f32 %v1621_v23  ;;  %v1617_v18 = vsub.f32 %v1607_v40, %v1612_v37 }
 0x76a   :  { %v1592_v28 = vpop.f32.mrb[64].mxu1 }
 0x76b   :  { %v1622_v44 = vadd.f32 1e-05, %v1617_v18  ;;  %v1608_v46 = vmul.f32 0.0625, %v1592_v28  ;;  %v3539_v34 = vpop.f32.mrb[65].mxu1  ;;  %v2653_v28 = vld [vmem:[%s5507_s9 + $0x40] sm:$0xff] }
 0x76d   :  { %4225 = vrsqrt.f32 %v1622_v44  ;;  %v1618_v48 = vsub.f32 %v1608_v46, %v1613_v42  ;;  %v1214_v42 = vld [vmem:[%s5507_s9 + $0x20] sm:$0xff] }
 0x76e   :  { %v1597_v49 = vpop.f32.mrb[66].mxu1 }
 0x76f   :  { %v1623_v53 = vadd.f32 1e-05, %v1618_v48  ;;  %v1609_v54 = vmul.f32 0.0625, %v1597_v49  ;;  %v3542_v56 = vpop.f32.mrb[67].mxu1  ;;  %v2654_v49 = vld [vmem:[%s5507_s9 + $0x48] sm:$0xff] }
 0x771   :  { %4227 = vrsqrt.f32 %v1623_v53  ;;  %v1619_v58 = vsub.f32 %v1609_v54, %v1614_v50 }
 0x772   :  { %v1602_v47 = vpop.f32.mrb[68].mxu1 }
 0x773   :  { %v4224_v62 = vpop.eup %4223  ;;  %v1624_v2 = vadd.f32 1e-05, %v1619_v58  ;;  %v1610_v3 = vmul.f32 0.0625, %v1602_v47  ;;  %v3545_v6 = vpop.f32.mrb[69].mxu1  ;;  %v1761_v58 = vld [vmem:[%s5508_s4] sm:$0xff] }
 0x774   :  { %v1631_v7 = vmul.f32 %v4224_v62, %v1210_v60  ;;  %v1764_v62 = vld [vmem:[%s5508_s4 + $0x18] sm:$0xff]  ;;  %v1766_v6 = vld [vmem:[%s5508_s4 + $0x28] sm:$0xff] }
 0x775   :  { %4229 = vrsqrt.f32 %v1624_v2  ;;  %v1620_v57 = vsub.f32 %v1610_v3, %v1615_v1  ;;  %v2584_v1 = vld [vmem:[%s5504_s8 + $0x58] sm:$0xff]  ;;  %v1765_v3 = vld [vmem:[%s5508_s4 + $0x20] sm:$0xff] }
 0x776   :  { %v1641_v45 = vmul.f32 %v1631_v7, %v1416_v29  ;;  %v1636_v24 = vmul.f32 %v1631_v7, %v4945_v16  ;;  %v1213_v16 = vld [vmem:[%s5507_s9 + $0x18] sm:$0xff]  ;;  %v2585_v7 = vld [vmem:[%s5504_s8 + $0x60] sm:$0xff] }
 0x777   :  { %v4226_v13 = vpop.eup %4225  ;;  %v1625_v19 = vadd.f32 1e-05, %v1620_v57  ;;  %v4085_v57 = vpack.c.bf16 %v1766_v6, %v1765_v3 }
 0x778   :  { %v1632_v21 = vmul.f32 %v4226_v13, %v1211_v61  ;;  %v1646_v25 = vsub.f32 %v2650_v15, %v1641_v45  ;;  %v1767_v61 = vld [vmem:[%s5508_s4 + $0x30] sm:$0xff]  ;;  %v1768_v15 = vld [vmem:[%s5508_s4 + $0x38] sm:$0xff]  ;;  %v2586_v45 = vld [vmem:[%s5504_s8 + $0x68] sm:$0xff] }
 0x779   :  { %4231 = vrsqrt.f32 %v1625_v19  ;;  %v4088_v13 = vpack.c.bf16 %v1768_v15, %v1767_v61  ;;  %v1769_v19 = vld [vmem:[%s5508_s4 + $0x40] sm:$0xff]  ;;  %v1885_v15 = vld [vmem:[%s5509_s5 + $0x70] sm:$0xff] }
 0x77a   :  { %v1642_v31 = vmul.f32 %v1632_v21, %v1417_v36  ;;  %v5076_v39 = vadd.f32 %v1646_v25, %v1636_v24  ;;  %v1637_v29 = vmul.f32 %v1632_v21, %v4947_v17  ;;  %v1770_v21 = vld [vmem:[%s5508_s4 + $0x48] sm:$0xff]  ;;  %v2587_v24 = vld [vmem:[%s5504_s8 + $0x70] sm:$0xff] }
 0x77b   :  { %v4228_v26 = vpop.eup %4227  ;;  %v4091_v25 = vpack.c.bf16 %v1770_v21, %v1769_v19  ;;  %v1779_v19 = vsub.s32 4, %v4392_v20 }
 0x77c   :  { %v1647_v32 = vsub.f32 %v2651_v22, %v1642_v31  ;;  %v1633_v33 = vmul.f32 %v4228_v26, %v1212_v27  ;;  %v1771_v22 = vld [vmem:[%s5508_s4 + $0x50] sm:$0xff]  ;;  %v1772_v27 = vld [vmem:[%s5508_s4 + $0x58] sm:$0xff]  ;;  %v1773_v26 = vld [vmem:[%s5508_s4 + $0x60] sm:$0xff] }
 0x77d   :  { %v4094_v31 = vpack.c.bf16 %v1772_v27, %v1771_v22  ;;  %v1780_v21 = vrot.slane %v4941_v9, %v1779_v19 }
 0x77e   :  { %v5085_v37 = vadd.f32 %v1647_v32, %v1637_v29  ;;  %v1643_v23 = vmul.f32 %v1633_v33, %v1418_v10  ;;  %v1638_v17 = vmul.f32 %v1633_v33, %v4954_v12  ;;  %v1774_v29 = vld [vmem:[%s5508_s4 + $0x68] sm:$0xff]  ;;  %v1775_v33 = vld [vmem:[%s5508_s4 + $0x70] sm:$0xff] }
 0x77f   :  { %v4230_v40 = vpop.eup %4229  ;;  %v4097_v32 = vpack.c.bf16 %v1774_v29, %v1773_v26 }
 0x780   :  { %v4073_v36 = vpack.c.bf16 %v5085_v37, %v5076_v39  ;;  %v1634_v41 = vmul.f32 %v4230_v40, %v1213_v16  ;;  %v1648_v18 = vsub.f32 %v2652_v35, %v1643_v23  ;;  %v1776_v16 = vld [vmem:[%s5508_s4 + $0x78] sm:$0xff]  ;;  %v1871_v23 = vld [vmem:[%s5509_s5] sm:$0xff]  ;;  %v1872_v40 = vld [vmem:[%s5509_s5 + $0x8] sm:$0xff] }
 0x781   :  { %v4100_v35 = vpack.c.bf16 %v1776_v16, %v1775_v33 }
 0x782   :  { %4074 = vmatpush3.bf16.msra.mxu0 %v4073_v36  ;;  %v1644_v44 = vmul.f32 %v1634_v41, %v1419_v43  ;;  %v5096_v46 = vadd.f32 %v1648_v18, %v1638_v17  ;;  %v1639_v34 = vmul.f32 %v1634_v41, %v4956_v30  ;;  %v1762_v30 = vld [vmem:[%s5508_s4 + $0x8] sm:$0xff]  ;;  %v1873_v36 = vld [vmem:[%s5509_s5 + $0x10] sm:$0xff]  ;;  %v4103_v41 = vpack.c.bf16 %v1872_v40, %v1871_v23  ;;  %v1874_v17 = vld [vmem:[%s5509_s5 + $0x18] sm:$0xff] }
 0x783   :  { %v4232_v10 = vpop.eup %4231  ;;  %4075 = vmatprep.subr.bf16.mxu0 %v4270_v0  ;;  %v4079_v47 = vpack.c.bf16 %v1762_v30, %v1761_v58  ;;  %v4106_v18 = vpack.c.bf16 %v1874_v17, %v1873_v36  ;;  %v1883_v58 = vld [vmem:[%s5509_s5 + $0x60] sm:$0xff]  ;;  %v1884_v30 = vld [vmem:[%s5509_s5 + $0x68] sm:$0xff]  ;;  %v1889_v17 = vsub.s32 5, %v4392_v20 }
 0x784   :  { %v1649_v48 = vsub.f32 %v2653_v28, %v1644_v44  ;;  %v1635_v12 = vmul.f32 %v4232_v10, %v1214_v42  ;;  %4104 = vmatpush3.bf16.msra.mxu1 %v4103_v41  ;;  %v1875_v28 = vld [vmem:[%s5509_s5 + $0x20] sm:$0xff]  ;;  %v1876_v42 = vld [vmem:[%s5509_s5 + $0x28] sm:$0xff]  ;;  %v1877_v10 = vld [vmem:[%s5509_s5 + $0x30] sm:$0xff] }
 0x785   :  { %4105 = vmatprep.subr.bf16.mxu1 %v4270_v0  ;;  %v4109_v44 = vpack.c.bf16 %v1876_v42, %v1875_v28  ;;  %v1890_v28 = vrot.slane %v4941_v9, %v1889_v17 }
 0x786   :  { %v5103_v50 = vadd.f32 %v1649_v48, %v1639_v34  ;;  %v1645_v53 = vmul.f32 %v1635_v12, %v1420_v52  ;;  %v1640_v43 = vmul.f32 %v1635_v12, %v4966_v38  ;;  %v2583_v52 = vld [vmem:[%s5504_s8 + $0x50] sm:$0xff]  ;;  %v1878_v34 = vld [vmem:[%s5509_s5 + $0x38] sm:$0xff]  ;;  %v1879_v12 = vld [vmem:[%s5509_s5 + $0x40] sm:$0xff] }
 0x787   :  { %v1763_v38 = vld [vmem:[%s5508_s4 + $0x10] sm:$0xff]  ;;  %v4112_v48 = vpack.c.bf16 %v1878_v34, %v1877_v10 }
 0x788   :  { %v4076_v54 = vpack.c.bf16 %v5103_v50, %v5096_v46  ;;  %v1650_v56 = vsub.f32 %v2654_v49, %v1645_v53  ;;  %v4082_v2 = vpack.c.bf16 %v1764_v62, %v1763_v38  ;;  %4107 = vmatpush3.bf16.msra.mxu1 %v4106_v18  ;;  %v1880_v49 = vld [vmem:[%s5509_s5 + $0x48] sm:$0xff] }
 0x789   :  { %4108 = vmatprep.subr.bf16.mxu1 %v4270_v0  ;;  %v4115_v53 = vpack.c.bf16 %v1880_v49, %v1879_v12 }
 0x78a   :  { %4077 = vmatpush3.bf16.msra.mxu0 %v4076_v54  ;;  %v5114_v60 = vadd.f32 %v1650_v56, %v1640_v43  ;;  %v1881_v54 = vld [vmem:[%s5509_s5 + $0x50] sm:$0xff]  ;;  %v1882_v43 = vld [vmem:[%s5509_s5 + $0x58] sm:$0xff] }
 0x78b   :  { %3554 = vmatprep.subr.mxu0 %v4272_v4  ;;  %v4118_v56 = vpack.c.bf16 %v1882_v43, %v1881_v54 }
 0x78c   :  { %4110 = vmatpush3.bf16.msra.mxu1 %v4109_v44 }
 0x78d   :  { %4111 = vmatprep.subr.bf16.mxu1 %v4270_v0 }
 0x78e   :  { %3555 = vmatpush3.msra.mxu0 %v5114_v60 }
 0x78f   :  { %3557 = vmatmul.mubr.msk.f32.vlgmr.msra.gmra.mrb[70].mxu0 %vm196_vm2, %v2583_v52  ;;  %4078 = vmatprep.subr.bf16.mxu0 %v4270_v0  ;;  %v4121_v52 = vpack.c.bf16 %v1884_v30, %v1883_v58 }
 0x790   :  { %3559 = vmatprep.mubr.msk.f32.mxu0 %vm4271_vm0, %v4272_v4  ;;  %4080 = vmatpush3.bf16.msra.mxu0 %v4079_v47 }
 0x791   :  { %4081 = vmatprep.subr.bf16.mxu0 %v4270_v0  ;;  %4113 = vmatpush3.bf16.msra.mxu1 %v4112_v48 }
 0x792   :  { %4114 = vmatprep.subr.bf16.mxu1 %v4270_v0 }
 0x793   :  { %3560 = vmatmul.mubr.msk.f32.gmra.mrb[72].mxu0 %vm196_vm2, %v2584_v1 }
 0x794   :  { %3562 = vmatprep.mubr.msk.f32.mxu0 %vm4271_vm0, %v4272_v4  ;;  %4083 = vmatpush3.bf16.msra.mxu0 %v4082_v2 }
 0x795   :  { %4084 = vmatprep.subr.bf16.mxu0 %v4270_v0  ;;  %4116 = vmatpush3.bf16.msra.mxu1 %v4115_v53 }
 0x796   :  { %4117 = vmatprep.subr.bf16.mxu1 %v4270_v0 }
 0x797   :  { %3563 = vmatmul.mubr.msk.f32.gmra.mrb[74].mxu0 %vm196_vm2, %v2585_v7 }
 0x798   :  { %3565 = vmatprep.mubr.msk.f32.mxu0 %vm4271_vm0, %v4272_v4  ;;  %4086 = vmatpush3.bf16.msra.mxu0 %v4085_v57 }
 0x799   :  { %4087 = vmatprep.subr.bf16.mxu0 %v4270_v0  ;;  %4119 = vmatpush3.bf16.msra.mxu1 %v4118_v56 }
 0x79a   :  { %4120 = vmatprep.subr.bf16.mxu1 %v4270_v0 }
 0x79b   :  { %3566 = vmatmul.mubr.msk.f32.gmra.mrb[76].mxu0 %vm196_vm2, %v2586_v45  ;;  %v1886_v45 = vld [vmem:[%s5509_s5 + $0x78] sm:$0xff] }
 0x79c   :  { %3568 = vmatprep.mubr.msk.f32.mxu0 %vm4271_vm0, %v4272_v4  ;;  %4089 = vmatpush3.bf16.msra.mxu0 %v4088_v13  ;;  %v4124_v13 = vpack.c.bf16 %v1886_v45, %v1885_v15  ;;  %v4266_v15 = vld [vmem:[%s5504_s8 + $0x10] sm:$0xff]  ;;  %v4267_v45 = vld [vmem:[%s5504_s8 + $0x18] sm:$0xff] }
 0x79d   :  { %4090 = vmatprep.subr.bf16.mxu0 %v4270_v0  ;;  %4122 = vmatpush3.bf16.msra.mxu1 %v4121_v52 }
 0x79e   :  { %4123 = vmatprep.subr.bf16.mxu1 %v4270_v0 }
 0x79f   :  { %3569 = vmatmul.mubr.msk.f32.gmra.mrb[78].mxu0 %vm196_vm2, %v2587_v24 }
 0x7a0   :  { %4092 = vmatpush3.bf16.msra.mxu0 %v4091_v25  ;;  %3603 = vmatprep.mubr.msk.f32.mxu0 %vm4271_vm0, %v4272_v4 }
 0x7a1   :  { %4093 = vmatprep.subr.bf16.mxu0 %v4270_v0  ;;  %4125 = vmatpush3.bf16.msra.mxu1 %v4124_v13  ;;  %v4268_v13 = vld [vmem:[%s5504_s8 + $0x20] sm:$0xff] }
 0x7a2   :  { %4132 = vmatprep.subr.bf16.mxu1 %v4270_v0 }
 0x7a4   :  { %4095 = vmatpush3.bf16.msra.mxu0 %v4094_v31 }
 0x7a5   :  { %4096 = vmatprep.subr.bf16.mxu0 %v4270_v0 }
 0x7a8   :  { %4098 = vmatpush3.bf16.msra.mxu0 %v4097_v32 }
 0x7a9   :  { %4099 = vmatprep.subr.bf16.mxu0 %v4270_v0 }
 0x7ac   :  { %4101 = vmatpush3.bf16.msra.mxu0 %v4100_v35 }
 0x7ad   :  { %4126 = vmatprep.subr.bf16.mxu0 %v4270_v0 }
 0x862   :  { %v1737_v47 = vpop.f32.mrb[70].mxu0 }
 0x863   :  { %v3558_v38 = vpop.f32.mrb[71].mxu0  ;;  %3604 = vmatmul.mubr.f32.vlgmr.msra.gmra.mrb[80].mxu0 %v1737_v47 }
 0x864   :  { %3606 = vmatprep.mubr.msk.f32.mxu0 %vm4271_vm0, %v4272_v4 }
 0x866   :  { %v1742_v62 = vpop.f32.mrb[72].mxu0 }
 0x867   :  { %v3561_v1 = vpop.f32.mrb[73].mxu0  ;;  %3607 = vmatmul.mubr.f32.gmra.mrb[82].mxu0 %v1742_v62 }
 0x868   :  { %3609 = vmatprep.mubr.msk.f32.mxu0 %vm4271_vm0, %v4272_v4 }
 0x86a   :  { %v1747_v2 = vpop.f32.mrb[74].mxu0 }
 0x86b   :  { %v3564_v3 = vpop.f32.mrb[75].mxu0  ;;  %3610 = vmatmul.mubr.f32.gmra.mrb[84].mxu0 %v1747_v2 }
 0x86c   :  { %3612 = vmatprep.mubr.msk.f32.mxu0 %vm4271_vm0, %v4272_v4  ;;  %v4264_v3 = vld [vmem:[%s5504_s8] sm:$0xff] }
 0x86e   :  { %v1752_v6 = vpop.f32.mrb[76].mxu0 }
 0x86f   :  { %v3567_v7 = vpop.f32.mrb[77].mxu0  ;;  %3613 = vmatmul.mubr.f32.gmra.mrb[86].mxu0 %v1752_v6 }
 0x870   :  { %3615 = vmatprep.mubr.msk.f32.mxu0 %vm4271_vm0, %v4272_v4 }
 0x872   :  { %v1757_v57 = vpop.f32.mrb[78].mxu0 }
 0x873   :  { %3616 = vmatmul.mubr.f32.gmra.mrb[88].mxu0 %v1757_v57  ;;  %v3570_v61 = vpop.f32.mrb[79].mxu0  ;;  %v4265_v57 = vld [vmem:[%s5504_s8 + $0x8] sm:$0xff] }
 0x874   :  { %3675 = vmatprep.mubr.msk.f32.mxu0 %vm4271_vm0, %v4272_v4 }
 0x936   :  { %v1847_v24 = vpop.f32.mrb[80].mxu0 }
 0x937   :  { %v1848_v25 = vadd.f32 %v1847_v24, %v1780_v21  ;;  %v3605_v22 = vpop.f32.mrb[81].mxu0 }
 0x939   :  { %3651 = vmatmul.mubr.f32.vlgmr.msra.gmra.mrb[70].mxu1 %v1848_v25 }
 0x93a   :  { %v1852_v27 = vpop.f32.mrb[82].mxu0  ;;  %3653 = vmatprep.mubr.msk.f32.mxu1 %vm4271_vm0, %v4272_v4  ;;  %4134 = vmatpush3.bf16.msra.mxu1 %v4438_v51 }
 0x93b   :  { %v1853_v31 = vadd.f32 %v1852_v27, %v1780_v21  ;;  %v3608_v26 = vpop.f32.mrb[83].mxu0  ;;  %4135 = vmatprep.subr.bf16.mxu1 %v4270_v0 }
 0x93d   :  { %3654 = vmatmul.mubr.f32.gmra.mrb[72].mxu1 %v1853_v31 }
 0x93e   :  { %v1857_v29 = vpop.f32.mrb[84].mxu0  ;;  %3656 = vmatprep.mubr.msk.f32.mxu1 %vm4271_vm0, %v4272_v4  ;;  %4137 = vmatpush3.bf16.msra.mxu1 %v4456_v55 }
 0x93f   :  { %v1858_v32 = vadd.f32 %v1857_v29, %v1780_v21  ;;  %v3611_v33 = vpop.f32.mrb[85].mxu0  ;;  %4138 = vmatprep.subr.bf16.mxu1 %v4270_v0 }
 0x941   :  { %3657 = vmatmul.mubr.f32.gmra.mrb[74].mxu1 %v1858_v32 }
 0x942   :  { %v1862_v16 = vpop.f32.mrb[86].mxu0  ;;  %3659 = vmatprep.mubr.msk.f32.mxu1 %vm4271_vm0, %v4272_v4  ;;  %4140 = vmatpush3.bf16.msra.mxu1 %v4477_v59 }
 0x943   :  { %v1863_v35 = vadd.f32 %v1862_v16, %v1780_v21  ;;  %v3614_v23 = vpop.f32.mrb[87].mxu0  ;;  %4141 = vmatprep.subr.bf16.mxu1 %v4270_v0 }
 0x944   :  { %v2440_v23 = vld [vmem:[%s5510_s6 + $0x8] sm:$0xff] }
 0x945   :  { %3660 = vmatmul.mubr.f32.gmra.mrb[76].mxu1 %v1863_v35  ;;  %v2439_v35 = vld [vmem:[%s5510_s6] sm:$0xff] }
 0x946   :  { %v1867_v40 = vpop.f32.mrb[88].mxu0  ;;  %3662 = vmatprep.mubr.msk.f32.mxu1 %vm4271_vm0, %v4272_v4  ;;  %4143 = vmatpush3.bf16.msra.mxu1 %v4498_v63 }
 0x947   :  { %v1868_v36 = vadd.f32 %v1867_v40, %v1780_v21  ;;  %v3617_v41 = vpop.f32.mrb[89].mxu0  ;;  %4144 = vmatprep.subr.bf16.mxu1 %v4270_v0  ;;  %v4187_v40 = vpack.c.bf16 %v2440_v23, %v2439_v35 }
 0x948   :  { %v2442_v41 = vld [vmem:[%s5510_s6 + $0x18] sm:$0xff] }
 0x949   :  { %3663 = vmatmul.mubr.f32.gmra.mrb[78].mxu1 %v1868_v36  ;;  %v2441_v36 = vld [vmem:[%s5510_s6 + $0x10] sm:$0xff] }
 0x94a   :  { %4146 = vmatpush3.bf16.msra.mxu1 %v4519_v5  ;;  %3722 = vmatprep.mubr.msk.f32.mxu1 %vm4271_vm0, %v4272_v4  ;;  %v4190_v17 = vpack.c.bf16 %v2442_v41, %v2441_v36 }
 0x94b   :  { %4147 = vmatprep.subr.bf16.mxu1 %v4270_v0 }
 0x94e   :  { %4149 = vmatpush3.bf16.msra.mxu1 %v4536_v8 }
 0x94f   :  { %4150 = vmatprep.subr.bf16.mxu1 %v4270_v0 }
 0x952   :  { %4152 = vmatpush3.bf16.msra.mxu1 %v4552_v11 }
 0x953   :  { %4153 = vmatprep.subr.bf16.mxu1 %v4270_v0 }
 0x956   :  { %4155 = vmatpush3.bf16.msra.mxu1 %v4564_v14 }
 0x957   :  { %4186 = vmatprep.subr.bf16.mxu1 %v4270_v0 }
 0xa0c   :  { %v1957_v18 = vpop.f32.mrb[70].mxu1 }
 0xa0d   :  { %v3652_v42 = vpop.f32.mrb[71].mxu1  ;;  %v5295_v10 = vadd.f32 %v1957_v18, %v1890_v28  ;;  %v2443_v18 = vld [vmem:[%s5510_s6 + $0x20] sm:$0xff] }
 0xa0f   :  { %v2166_v62 = vmul.f32 %v5295_v10, %v5295_v10 }
 0xa10   :  { %v1962_v44 = vpop.f32.mrb[72].mxu1 }
 0xa11   :  { %v5297_v34 = vadd.f32 %v1962_v44, %v1890_v28  ;;  %v3655_v48 = vpop.f32.mrb[73].mxu1  ;;  %v2445_v44 = vld [vmem:[%s5510_s6 + $0x30] sm:$0xff] }
 0xa12   :  { %v2446_v48 = vld [vmem:[%s5510_s6 + $0x38] sm:$0xff] }
 0xa13   :  { %v4127_v12 = vpack.c.bf16 %v5297_v34, %v5295_v10  ;;  %v2167_v52 = vmul.f32 %v5297_v34, %v5297_v34 }
 0xa14   :  { %v1967_v49 = vpop.f32.mrb[74].mxu1 }
 0xa15   :  { %v3658_v53 = vpop.f32.mrb[75].mxu1  ;;  %4128 = vmatpush3.bf16.msra.mxu0 %v4127_v12  ;;  %v5302_v43 = vadd.f32 %v1967_v49, %v1890_v28  ;;  %v4157_v1 = vpack.c.bf16 %v2167_v52, %v2166_v62  ;;  %v4196_v12 = vpack.c.bf16 %v2446_v48, %v2445_v44  ;;  %v2447_v49 = vld [vmem:[%s5510_s6 + $0x40] sm:$0xff] }
 0xa16   :  { %4129 = vmatprep.subr.bf16.mxu0 %v4270_v0  ;;  %v2448_v53 = vld [vmem:[%s5510_s6 + $0x48] sm:$0xff]  ;;  %v2451_v52 = vld [vmem:[%s5510_s6 + $0x60] sm:$0xff] }
 0xa17   :  { %v2168_v6 = vmul.f32 %v5302_v43, %v5302_v43  ;;  %v4269_v48 = vld [vmem:[%s5502_s10] sm:$0xff] }
 0xa18   :  { %v1972_v54 = vpop.f32.mrb[76].mxu1 }
 0xa19   :  { %v5304_v56 = vadd.f32 %v1972_v54, %v1890_v28  ;;  %v3661_v9 = vpop.f32.mrb[77].mxu1  ;;  %v4199_v54 = vpack.c.bf16 %v2448_v53, %v2447_v49  ;;  %v2397_v49 = vsub.s32 7, %v4392_v20 }
 0xa1a   :  { %v2449_v9 = vld [vmem:[%s5510_s6 + $0x50] sm:$0xff] }
 0xa1b   :  { %v4130_v58 = vpack.c.bf16 %v5304_v56, %v5302_v43  ;;  %v2169_v2 = vmul.f32 %v5304_v56, %v5304_v56 }
 0xa1c   :  { %v1977_v30 = vpop.f32.mrb[78].mxu1 }
 0xa1d   :  { %4131 = vmatpush3.bf16.msra.mxu0 %v4130_v58  ;;  %v5310_v47 = vadd.f32 %v1977_v30, %v1890_v28  ;;  %v3664_v38 = vpop.f32.mrb[79].mxu1  ;;  %v4160_v7 = vpack.c.bf16 %v2169_v2, %v2168_v6  ;;  %v2444_v28 = vld [vmem:[%s5510_s6 + $0x28] sm:$0xff]  ;;  %v2450_v58 = vld [vmem:[%s5510_s6 + $0x58] sm:$0xff] }
 0xa1e   :  { %3673 = vmatprep.subr.mxu0 %v4272_v4  ;;  %v4193_v42 = vpack.c.bf16 %v2444_v28, %v2443_v18  ;;  %v4202_v30 = vpack.c.bf16 %v2450_v58, %v2449_v9  ;;  %v2452_v38 = vld [vmem:[%s5510_s6 + $0x68] sm:$0xff]  ;;  %v2454_v2 = vld [vmem:[%s5510_s6 + $0x78] sm:$0xff] }
 0xa1f   :  { %v2170_v61 = vmul.f32 %v5310_v47, %v5310_v47  ;;  %v4205_v62 = vpack.c.bf16 %v2452_v38, %v2451_v52 }
 0xa21   :  { %3674 = vmatpush3.msra.mxu0 %v5310_v47 }
 0xa22   :  { %3676 = vmatmul.mubr.msk.f32.vlgmr.msra.gmra.mrb[90].mxu0 %vm196_vm2, %v4264_v3  ;;  %4156 = vmatprep.subr.bf16.mxu0 %v4270_v0 }
 0xa23   :  { %4158 = vmatpush3.bf16.msra.mxu0 %v4157_v1  ;;  %3678 = vmatprep.mubr.msk.f32.mxu0 %vm4271_vm0, %v4272_v4  ;;  %v2453_v1 = vld [vmem:[%s5510_s6 + $0x70] sm:$0xff] }
 0xa24   :  { %4159 = vmatprep.subr.bf16.mxu0 %v4270_v0 }
 0xa26   :  { %3679 = vmatmul.mubr.msk.f32.gmra.mrb[92].mxu0 %vm196_vm2, %v4265_v57 }
 0xa27   :  { %4161 = vmatpush3.bf16.msra.mxu0 %v4160_v7  ;;  %3681 = vmatprep.mubr.msk.f32.mxu0 %vm4271_vm0, %v4272_v4 }
 0xa28   :  { %3745 = vmatprep.subr.mxu0 %v4272_v4 }
 0xa2a   :  { %3682 = vmatmul.mubr.msk.f32.gmra.mrb[94].mxu0 %vm196_vm2, %v4266_v15 }
 0xa2b   :  { %3746 = vmatpush3.msra.mxu0 %v2170_v61  ;;  %3684 = vmatprep.mubr.msk.f32.mxu0 %vm4271_vm0, %v4272_v4 }
 0xa2c   :  { %4162 = vmatprep.subr.bf16.mxu0 %v4270_v0 }
 0xa2e   :  { %3685 = vmatmul.mubr.msk.f32.gmra.mrb[96].mxu0 %vm196_vm2, %v4267_v45 }
 0xa2f   :  { %3687 = vmatprep.mubr.msk.f32.mxu0 %vm4271_vm0, %v4272_v4 }
 0xa32   :  { %3688 = vmatmul.mubr.msk.f32.gmra.mrb[98].mxu0 %vm196_vm2, %v4268_v13 }
 0xa33   :  { %3747 = vmatprep.mubr.msk.f32.mxu0 %vm4271_vm0, %v4272_v4 }
 0xa36   :  { %3748 = vmatmul.mubr.msk.f32.vlgmr.msra.gmra.mrb[100].mxu0 %vm196_vm2, %v4264_v3  ;;  %v4208_v3 = vpack.c.bf16 %v2454_v2, %v2453_v1  ;;  %v2398_v1 = vrot.slane %v4269_v48, %v2397_v49 }
 0xa37   :  { %3750 = vmatprep.mubr.msk.f32.mxu0 %vm4271_vm0, %v4272_v4  ;;  %4164 = vmatpush3.bf16.msra.mxu0 %v4438_v51 }
 0xa38   :  { %4165 = vmatprep.subr.bf16.mxu0 %v4270_v0 }
 0xa3a   :  { %3751 = vmatmul.mubr.msk.f32.gmra.mrb[102].mxu0 %vm196_vm2, %v4265_v57 }
 0xa3b   :  { %3753 = vmatprep.mubr.msk.f32.mxu0 %vm4271_vm0, %v4272_v4  ;;  %4167 = vmatpush3.bf16.msra.mxu0 %v4456_v55 }
 0xa3c   :  { %4168 = vmatprep.subr.bf16.mxu0 %v4270_v0 }
 0xa3e   :  { %3754 = vmatmul.mubr.msk.f32.gmra.mrb[104].mxu0 %vm196_vm2, %v4266_v15 }
 0xa3f   :  { %3756 = vmatprep.mubr.msk.f32.mxu0 %vm4271_vm0, %v4272_v4  ;;  %4170 = vmatpush3.bf16.msra.mxu0 %v4477_v59 }
 0xa40   :  { %4171 = vmatprep.subr.bf16.mxu0 %v4270_v0 }
 0xa42   :  { %3757 = vmatmul.mubr.msk.f32.gmra.mrb[106].mxu0 %vm196_vm2, %v4267_v45 }
 0xa43   :  { %3759 = vmatprep.mubr.msk.f32.mxu0 %vm4271_vm0, %v4272_v4  ;;  %4173 = vmatpush3.bf16.msra.mxu0 %v4498_v63 }
 0xa44   :  { %4174 = vmatprep.subr.bf16.mxu0 %v4270_v0 }
 0xa46   :  { %3760 = vmatmul.mubr.msk.f32.gmra.mrb[108].mxu0 %vm196_vm2, %v4268_v13 }
 0xa47   :  { %4176 = vmatpush3.bf16.msra.mxu0 %v4519_v5  ;;  %3794 = vmatprep.mubr.msk.f32.mxu0 %vm4271_vm0, %v4272_v4 }
 0xa48   :  { %4177 = vmatprep.subr.bf16.mxu0 %v4270_v0 }
 0xa4b   :  { %4179 = vmatpush3.bf16.msra.mxu0 %v4536_v8 }
 0xa4c   :  { %4180 = vmatprep.subr.bf16.mxu0 %v4270_v0 }
 0xa4f   :  { %4182 = vmatpush3.bf16.msra.mxu0 %v4552_v11 }
 0xa50   :  { %4183 = vmatprep.subr.bf16.mxu0 %v4270_v0 }
 0xa53   :  { %4185 = vmatpush3.bf16.msra.mxu0 %v4564_v14 }
 0xaf5   :  { %v2047_v51 = vpop.f32.mrb[90].mxu0 }
 0xaf6   :  { %v3677_v55 = vpop.f32.mrb[91].mxu0  ;;  %3723 = vmatmul.mubr.f32.vlgmr.msra.gmra.mrb[80].mxu1 %v2047_v51 }
 0xaf7   :  { %3725 = vmatprep.mubr.msk.f32.mxu1 %vm4271_vm0, %v4272_v4  ;;  %4188 = vmatpush3.bf16.msra.mxu1 %v4187_v40  ;;  %v2378_v40 = vsub.s32 6, %v4392_v20 }
 0xaf8   :  { %4189 = vmatprep.subr.bf16.mxu1 %v4270_v0 }
 0xaf9   :  { %v2052_v59 = vpop.f32.mrb[92].mxu0 }
 0xafa   :  { %v3680_v63 = vpop.f32.mrb[93].mxu0  ;;  %3726 = vmatmul.mubr.f32.gmra.mrb[82].mxu1 %v2052_v59 }
 0xafb   :  { %3728 = vmatprep.mubr.msk.f32.mxu1 %vm4271_vm0, %v4272_v4  ;;  %4191 = vmatpush3.bf16.msra.mxu1 %v4190_v17 }
 0xafc   :  { %4192 = vmatprep.subr.bf16.mxu1 %v4270_v0 }
 0xafd   :  { %v2057_v5 = vpop.f32.mrb[94].mxu0 }
 0xafe   :  { %v3683_v8 = vpop.f32.mrb[95].mxu0  ;;  %3729 = vmatmul.mubr.f32.gmra.mrb[84].mxu1 %v2057_v5 }
 0xaff   :  { %3731 = vmatprep.mubr.msk.f32.mxu1 %vm4271_vm0, %v4272_v4  ;;  %4194 = vmatpush3.bf16.msra.mxu1 %v4193_v42 }
 0xb00   :  { %4195 = vmatprep.subr.bf16.mxu1 %v4270_v0 }
 0xb01   :  { %v2062_v11 = vpop.f32.mrb[96].mxu0 }
 0xb02   :  { %v3686_v14 = vpop.f32.mrb[97].mxu0  ;;  %3732 = vmatmul.mubr.f32.gmra.mrb[86].mxu1 %v2062_v11 }
 0xb03   :  { %3734 = vmatprep.mubr.msk.f32.mxu1 %vm4271_vm0, %v4272_v4  ;;  %4197 = vmatpush3.bf16.msra.mxu1 %v4196_v12  ;;  %v2379_v12 = vrot.slane %v4269_v48, %v2378_v40 }
 0xb04   :  { %4198 = vmatprep.subr.bf16.mxu1 %v4270_v0 }
 0xb05   :  { %v2067_v19 = vpop.f32.mrb[98].mxu0 }
 0xb06   :  { %v3689_v21 = vpop.f32.mrb[99].mxu0  ;;  %3735 = vmatmul.mubr.f32.gmra.mrb[88].mxu1 %v2067_v19 }
 0xb07   :  { %3841 = vmatprep.mubr.msk.f32.mxu1 %vm4271_vm0, %v4272_v4  ;;  %4200 = vmatpush3.bf16.msra.mxu1 %v4199_v54 }
 0xb08   :  { %4201 = vmatprep.subr.bf16.mxu1 %v4270_v0 }
 0xb09   :  { %v2237_v24 = vpop.f32.mrb[100].mxu0 }
 0xb0a   :  { %3795 = vmatmul.mubr.f32.vlgmr.msra.gmra.mrb[110].mxu0 %v2237_v24  ;;  %v3749_v25 = vpop.f32.mrb[101].mxu0 }
 0xb0b   :  { %3797 = vmatprep.mubr.msk.f32.mxu0 %vm4271_vm0, %v4272_v4  ;;  %4203 = vmatpush3.bf16.msra.mxu1 %v4202_v30 }
 0xb0c   :  { %4204 = vmatprep.subr.bf16.mxu1 %v4270_v0 }
 0xb0d   :  { %v2242_v22 = vpop.f32.mrb[102].mxu0 }
 0xb0e   :  { %3798 = vmatmul.mubr.f32.gmra.mrb[112].mxu0 %v2242_v22  ;;  %v3752_v27 = vpop.f32.mrb[103].mxu0 }
 0xb0f   :  { %3800 = vmatprep.mubr.msk.f32.mxu0 %vm4271_vm0, %v4272_v4  ;;  %4206 = vmatpush3.bf16.msra.mxu1 %v4205_v62 }
 0xb10   :  { %4207 = vmatprep.subr.bf16.mxu1 %v4270_v0 }
 0xb11   :  { %v2247_v31 = vpop.f32.mrb[104].mxu0 }
 0xb12   :  { %3801 = vmatmul.mubr.f32.gmra.mrb[114].mxu0 %v2247_v31  ;;  %v3755_v26 = vpop.f32.mrb[105].mxu0 }
 0xb13   :  { %3803 = vmatprep.mubr.msk.f32.mxu0 %vm4271_vm0, %v4272_v4  ;;  %4209 = vmatpush3.bf16.msra.mxu1 %v4208_v3 }
 0xb15   :  { %v2252_v29 = vpop.f32.mrb[106].mxu0 }
 0xb16   :  { %3804 = vmatmul.mubr.f32.gmra.mrb[116].mxu0 %v2252_v29  ;;  %v3758_v32 = vpop.f32.mrb[107].mxu0 }
 0xb17   :  { %3806 = vmatprep.mubr.msk.f32.mxu0 %vm4271_vm0, %v4272_v4 }
 0xb19   :  { %v2257_v33 = vpop.f32.mrb[108].mxu0 }
 0xb1a   :  { %3807 = vmatmul.mubr.f32.gmra.mrb[118].mxu0 %v2257_v33  ;;  %v3761_v16 = vpop.f32.mrb[109].mxu0 }
 0xbc9   :  { %v2137_v6 = vpop.f32.mrb[80].mxu1 }
 0xbca   :  { %v3724_v7 = vpop.f32.mrb[81].mxu1  ;;  %v2161_v59 = vmul.f32 0.0625, %v2137_v6 }
 0xbcc   :  { %v2356_v8 = vmul.f32 %v2161_v59, %v2161_v59 }
 0xbcd   :  { %v2142_v57 = vpop.f32.mrb[82].mxu1 }
 0xbce   :  { %v3727_v61 = vpop.f32.mrb[83].mxu1  ;;  %v2162_v11 = vmul.f32 0.0625, %v2142_v57 }
 0xbd0   :  { %v2357_v0 = vmul.f32 %v2162_v11, %v2162_v11 }
 0xbd1   :  { %v2147_v15 = vpop.f32.mrb[84].mxu1 }
 0xbd2   :  { %v3730_v45 = vpop.f32.mrb[85].mxu1  ;;  %v2163_v25 = vmul.f32 0.0625, %v2147_v15 }
 0xbd4   :  { %v2358_v32 = vmul.f32 %v2163_v25, %v2163_v25 }
 0xbd5   :  { %v2152_v13 = vpop.f32.mrb[86].mxu1 }
 0xbd6   :  { %v3733_v51 = vpop.f32.mrb[87].mxu1  ;;  %v2164_v33 = vmul.f32 0.0625, %v2152_v13 }
 0xbd8   :  { %v2359_v17 = vmul.f32 %v2164_v33, %v2164_v33 }
 0xbd9   :  { %v2157_v55 = vpop.f32.mrb[88].mxu1 }
 0xbda   :  { %v3736_v63 = vpop.f32.mrb[89].mxu1  ;;  %v2165_v18 = vmul.f32 0.0625, %v2157_v55 }
 0xbdc   :  { %v2360_v58 = vmul.f32 %v2165_v18, %v2165_v18 }
 0xbdd   :  { %v2327_v5 = vpop.f32.mrb[110].mxu0 }
 0xbde   :  { %v2351_v14 = vmul.f32 0.0625, %v2327_v5  ;;  %v3796_v19 = vpop.f32.mrb[111].mxu0 }
 0xbe0   :  { %v2361_v21 = vsub.f32 %v2351_v14, %v2356_v8 }
 0xbe1   :  { %v2332_v24 = vpop.f32.mrb[112].mxu0 }
 0xbe2   :  { %v2366_v22 = vadd.f32 1e-05, %v2361_v21  ;;  %v2352_v27 = vmul.f32 0.0625, %v2332_v24  ;;  %v3799_v31 = vpop.f32.mrb[113].mxu0 }
 0xbe4   :  { %4233 = vrsqrt.f32 %v2366_v22  ;;  %v2362_v26 = vsub.f32 %v2352_v27, %v2357_v0 }
 0xbe5   :  { %v2337_v29 = vpop.f32.mrb[114].mxu0 }
 0xbe6   :  { %v2367_v16 = vadd.f32 1e-05, %v2362_v26  ;;  %v2353_v35 = vmul.f32 0.0625, %v2337_v29  ;;  %v3802_v23 = vpop.f32.mrb[115].mxu0 }
 0xbe8   :  { %4235 = vrsqrt.f32 %v2367_v16  ;;  %v2363_v36 = vsub.f32 %v2353_v35, %v2358_v32 }
 0xbe9   :  { %v2342_v41 = vpop.f32.mrb[116].mxu0 }
 0xbea   :  { %v2368_v28 = vadd.f32 1e-05, %v2363_v36  ;;  %v2354_v42 = vmul.f32 0.0625, %v2342_v41  ;;  %v3805_v44 = vpop.f32.mrb[117].mxu0 }
 0xbec   :  { %4237 = vrsqrt.f32 %v2368_v28  ;;  %v2364_v53 = vsub.f32 %v2354_v42, %v2359_v17 }
 0xbed   :  { %v2347_v54 = vpop.f32.mrb[118].mxu0 }
 0xbee   :  { %v4234_v9 = vpop.eup %4233  ;;  %v2369_v30 = vadd.f32 1e-05, %v2364_v53  ;;  %v2355_v52 = vmul.f32 0.0625, %v2347_v54  ;;  %v3808_v38 = vpop.f32.mrb[119].mxu0 }
 0xbef   :  { %v2380_v62 = vmul.f32 %v4234_v9, %v2379_v12 }
 0xbf0   :  { %4239 = vrsqrt.f32 %v2369_v30  ;;  %v2365_v2 = vsub.f32 %v2355_v52, %v2360_v58 }
 0xbf1   :  { %v2390_v3 = vmul.f32 %v2380_v62, %v2161_v59  ;;  %v2385_v57 = vmul.f32 %v2380_v62, %v5295_v10 }
 0xbf2   :  { %v4236_v6 = vpop.eup %4235  ;;  %v2370_v7 = vadd.f32 1e-05, %v2365_v2 }
 0xbf3   :  { %v2399_v61 = vsub.f32 %v2398_v1, %v2390_v3  ;;  %v2381_v15 = vmul.f32 %v4236_v6, %v2379_v12  ;;  %v2680_v6 = vld [vmem:[%s5502_s10 + $0x8] ss:$0 sm:$0xff] }
 0xbf4   :  { %4241 = vrsqrt.f32 %v2370_v7 }
 0xbf5   :  { %v2404_v20 = vadd.f32 %v2399_v61, %v2385_v57  ;;  %v2391_v45 = vmul.f32 %v2381_v15, %v2162_v11  ;;  %v2386_v55 = vmul.f32 %v2381_v15, %v5297_v34 }
 0xbf6   :  { %v4238_v13 = vpop.eup %4237 }
 0xbf7   :  { %v2409_v51 = vsub.f32 0.0, %v2404_v20  ;;  %v2400_v63 = vsub.f32 %v2398_v1, %v2391_v45  ;;  %v2382_v5 = vmul.f32 %v4238_v13, %v2379_v12 }
 0xbf9   :  { %v2414_v8 = vmul.f32 1.442695, %v2409_v51  ;;  %v2405_v14 = vadd.f32 %v2400_v63, %v2386_v55  ;;  %v2392_v19 = vmul.f32 %v2382_v5, %v2163_v25  ;;  %v2387_v59 = vmul.f32 %v2382_v5, %v5302_v43 }
 0xbfa   :  { %v4240_v21 = vpop.eup %4239 }
 0xbfb   :  { %4243 = vpow2.f32 %v2414_v8  ;;  %v2410_v24 = vsub.f32 0.0, %v2405_v14  ;;  %v2401_v10 = vsub.f32 %v2398_v1, %v2392_v19  ;;  %v2383_v0 = vmul.f32 %v4240_v21, %v2379_v12 }
 0xbfd   :  { %v2416_v22 = vmul.f32 1.442695, %v2410_v24  ;;  %v2406_v27 = vadd.f32 %v2401_v10, %v2387_v59  ;;  %v2393_v31 = vmul.f32 %v2383_v0, %v2164_v33  ;;  %v2388_v26 = vmul.f32 %v2383_v0, %v5304_v56 }
 0xbfe   :  { %v4242_v11 = vpop.eup %4241 }
 0xbff   :  { %4245 = vpow2.f32 %v2416_v22  ;;  %v2411_v34 = vsub.f32 0.0, %v2406_v27  ;;  %v2402_v29 = vsub.f32 %v2398_v1, %v2393_v31  ;;  %v2384_v32 = vmul.f32 %v4242_v11, %v2379_v12 }
 0xc01   :  { %v2418_v16 = vmul.f32 1.442695, %v2411_v34  ;;  %v2407_v35 = vadd.f32 %v2402_v29, %v2388_v26  ;;  %v2394_v25 = vmul.f32 %v2384_v32, %v2165_v18  ;;  %v2389_v43 = vmul.f32 %v2384_v32, %v5310_v47 }
 0xc03   :  { %4247 = vpow2.f32 %v2418_v16  ;;  %v2412_v23 = vsub.f32 0.0, %v2407_v35  ;;  %v2403_v40 = vsub.f32 %v2398_v1, %v2394_v25 }
 0xc05   :  { %v4244_v36 = vpop.eup %4243  ;;  %v2420_v41 = vmul.f32 1.442695, %v2412_v23  ;;  %v2408_v17 = vadd.f32 %v2403_v40, %v2389_v43 }
 0xc06   :  { %v2424_v28 = vadd.f32 1.0, %v4244_v36 }
 0xc07   :  { %4249 = vpow2.f32 %v2420_v41  ;;  %v2413_v33 = vsub.f32 0.0, %v2408_v17 }
 0xc08   :  { %4251 = vrcp.f32 %v2424_v28 }
 0xc09   :  { %v4246_v56 = vpop.eup %4245  ;;  %v2422_v42 = vmul.f32 1.442695, %v2413_v33 }
 0xc0a   :  { %v2425_v44 = vadd.f32 1.0, %v4246_v56 }
 0xc0b   :  { %4253 = vpow2.f32 %v2422_v42 }
 0xc0c   :  { %4255 = vrcp.f32 %v2425_v44 }
 0xc0d   :  { %v4248_v48 = vpop.eup %4247 }
 0xc0e   :  { %v2426_v12 = vadd.f32 1.0, %v4248_v48 }
 0xc10   :  { %4257 = vrcp.f32 %v2426_v12 }
 0xc11   :  { %v4250_v18 = vpop.eup %4249 }
 0xc12   :  { %v4252_v49 = vpop.eup %4251  ;;  %v2427_v53 = vadd.f32 1.0, %v4250_v18 }
 0xc13   :  { %v2434_v47 = vmul.f32 %v4252_v49, %v2404_v20 }
 0xc14   :  { %4259 = vrcp.f32 %v2427_v53 }
 0xc15   :  { %v4254_v54 = vpop.eup %4253  ;;  %3842 = vmatmul.mubr.f32.vlgmr.msra.gmra.mrb[90].mxu1 %v2434_v47 }
 0xc16   :  { %v4256_v9 = vpop.eup %4255  ;;  %3844 = vmatprep.mubr.msk.f32.mxu1 %vm4271_vm0, %v4272_v4  ;;  %v2428_v58 = vadd.f32 1.0, %v4254_v54 }
 0xc17   :  { %v2435_v30 = vmul.f32 %v4256_v9, %v2405_v14 }
 0xc18   :  { %4261 = vrcp.f32 %v2428_v58 }
 0xc19   :  { %3845 = vmatmul.mubr.f32.gmra.mrb[92].mxu1 %v2435_v30 }
 0xc1a   :  { %v4258_v52 = vpop.eup %4257  ;;  %3847 = vmatprep.mubr.msk.f32.mxu1 %vm4271_vm0, %v4272_v4 }
 0xc1b   :  { %v2436_v38 = vmul.f32 %v4258_v52, %v2406_v27 }
 0xc1d   :  { %3848 = vmatmul.mubr.f32.gmra.mrb[94].mxu1 %v2436_v38 }
 0xc1e   :  { %v4260_v62 = vpop.eup %4259  ;;  %3850 = vmatprep.mubr.msk.f32.mxu1 %vm4271_vm0, %v4272_v4 }
 0xc1f   :  { %v2437_v1 = vmul.f32 %v4260_v62, %v2407_v35 }
 0xc21   :  { %3851 = vmatmul.mubr.f32.gmra.mrb[96].mxu1 %v2437_v1 }
 0xc22   :  { %v4262_v2 = vpop.eup %4261  ;;  %3853 = vmatprep.mubr.msk.f32.mxu1 %vm4271_vm0, %v4272_v4 }
 0xc23   :  { %v2438_v3 = vmul.f32 %v4262_v2, %v2408_v17 }
 0xc25   :  { %3854 = vmatmul.mubr.f32.gmra.mrb[98].mxu1 %v2438_v3 }
 0xce8   :  { %v2525_v7 = vpop.f32.mrb[90].mxu1 }
 0xce9   :  { %v2526_v57 = vadd.f32 %v2680_v6, %v2525_v7  ;;  %v3843_v61 = vpop.f32.mrb[91].mxu1 }
 0xceb   :  { %v2549_v15 = vadd.f32 %v2526_v57, %v5076_v39 }
 0xcec   :  { %v2530_v20 = vpop.f32.mrb[92].mxu1 }
 0xced   :  { %vm2554_vm8 = vcmp.ge.f32.partialorder %v2549_v15, 0.0  ;;  %v2559_v45 = vmul.f32 0.01, %v2549_v15  ;;  %v2531_v13 = vadd.f32 %v2680_v6, %v2530_v20  ;;  %v3846_v51 = vpop.f32.mrb[93].mxu1 }
 0xcef   :  { %v2564_v55 = vsel %vm2554_vm8, %v2549_v15, %v2559_v45  ;;  %v2550_v63 = vadd.f32 %v2531_v13, %v5085_v37 }
 0xcf0   :  { %2569 = vst [vmem:[%s5511_s11] sm:$0xff] %v2564_v55  ;;  %v2535_v4 = vpop.f32.mrb[94].mxu1 }
 0xcf1   :  { %vm2555_vm9 = vcmp.ge.f32.partialorder %v2550_v63, 0.0  ;;  %v2560_v5 = vmul.f32 0.01, %v2550_v63  ;;  %v2536_v8 = vadd.f32 %v2680_v6, %v2535_v4  ;;  %v3849_v14 = vpop.f32.mrb[95].mxu1 }
 0xcf3   :  { %v2565_v19 = vsel %vm2555_vm9, %v2550_v63, %v2560_v5  ;;  %v2551_v39 = vadd.f32 %v2536_v8, %v5096_v46 }
 0xcf4   :  { %2570 = vst [vmem:[%s5511_s11 + $0x8] sm:$0xff] %v2565_v19  ;;  %v2540_v21 = vpop.f32.mrb[96].mxu1 }
 0xcf5   :  { %vm2556_vm10 = vcmp.ge.f32.partialorder %v2551_v39, 0.0  ;;  %v2561_v59 = vmul.f32 0.01, %v2551_v39  ;;  %v2541_v37 = vadd.f32 %v2680_v6, %v2540_v21  ;;  %v3852_v24 = vpop.f32.mrb[97].mxu1 }
 0xcf7   :  { %v2566_v10 = vsel %vm2556_vm10, %v2551_v39, %v2561_v59  ;;  %v2552_v0 = vadd.f32 %v2541_v37, %v5103_v50 }
 0xcf8   :  { %2571 = vst [vmem:[%s5511_s11 + $0x10] sm:$0xff] %v2566_v10  ;;  %v2545_v22 = vpop.f32.mrb[98].mxu1 }
 0xcf9   :  { %vm2557_vm11 = vcmp.ge.f32.partialorder %v2552_v0, 0.0  ;;  %v2562_v27 = vmul.f32 0.01, %v2552_v0  ;;  %v2546_v46 = vadd.f32 %v2680_v6, %v2545_v22  ;;  %v3855_v31 = vpop.f32.mrb[99].mxu1 }
 0xcfb   :  { %v2567_v11 = vsel %vm2557_vm11, %v2552_v0, %v2562_v27  ;;  %v2553_v26 = vadd.f32 %v2546_v46, %v5114_v60 }
 0xcfc   :  { %2572 = vst [vmem:[%s5511_s11 + $0x18] sm:$0xff] %v2567_v11 }
 0xcfd   :  { %vm2558_vm12 = vcmp.ge.f32.partialorder %v2553_v26, 0.0  ;;  %v2563_v34 = vmul.f32 0.01, %v2553_v26 }
 0xcff   :  { %v2568_v29 = vsel %vm2558_vm12, %v2553_v26, %v2563_v34 }
 0xd00   :  { %2573 = vst [vmem:[%s5511_s11 + $0x20] sm:$0xff] %v2568_v29 }

</bundles_post_ra>
